<compile_context>
chip_gen: v7x
topology: tpu7x:2x2x1
jax: 0.10.0
libtpu: 0.0.40
codegen_flags: <defaults>
</compile_context>

<pallas_src>
import functools

import jax
import jax.numpy as jnp
from jax import lax
from jax.experimental import pallas as pl
from jax.experimental.pallas import tpu as pltpu


def _round_up(x, m):
    return (x + m - 1) // m * m


def _ceil_div(a, b):
    return -(-a // b)


# -------------- Pallas kernel: per-tap accumulating dots + bias + TLU ---------
def _conv_tlu_kernel(x_ref, w_ref, pab_ref, o_ref, *, cout, tp, offsets):
    # x_ref:   (Cin_p, F_flat)       replicate-padded, flattened spatial box
    # w_ref:   (n_taps, Cout, Cin_p) per-tap conv weights (zero-padded Cin)
    # pab_ref: (Cout, 3)             fused per-channel [bias | alpha | beta] (f32)
    # o_ref:   (Cout, Tp)            lane-dense output tile, Tp % 128 == 0
    bias = pab_ref[:, 0:1]
    alpha = pab_ref[:, 1:2]
    beta = pab_ref[:, 2:3]

    # bias folded into the accumulator init -> no separate "+ bias" pass.
    acc = jnp.broadcast_to(bias, (cout, tp))
    for k, off in enumerate(offsets):
        acc = acc + jnp.dot(w_ref[k], x_ref[:, off:off + tp],
                            preferred_element_type=jnp.float32)

    # TLU epilogue in f32; cast only on the final store.
    o_ref[...] = jnp.where(acc >= 0.0, beta * acc, alpha * acc).astype(o_ref.dtype)


# -------------------- tiling helpers --------------------
def _vmem_budget_bytes():
    cap = 64 * 1024 * 1024
    try:
        cap = int(getattr(pltpu.get_tpu_info(), "vmem_capacity_bytes", cap))
    except Exception:
        pass
    # ~48 MiB on v7x (64 MiB / TC), ~96 MiB on v5e/v6e (128 MiB).
    return (3 * cap) // 4


def _tile_bytes(td, plane, pd, off_tail, cin_p, cout, n_taps, csize, osize):
    t = td * plane
    tp = _round_up(t, 128)
    e = _ceil_div((tp - t) + off_tail, plane)
    f_flat = (td + 2 * pd + e) * plane
    return (2 * cin_p * f_flat * csize          # double-buffered input blocks
            + 2 * cout * tp * osize             # double-buffered output blocks
            + 3 * cout * tp * 4                 # f32 accumulator + dot temporaries
            + cin_p * tp * csize                # shifted-slice operand temporary
            + n_taps * cout * cin_p * csize + cout * 3 * 4)


# -------------------- module wrapper --------------------
def emnet_base_module_3d(x, weight, bias, alpha, beta, *,
                         compute_dtype=jnp.bfloat16, out_dtype=jnp.float32):
    """Forward of EMNetBaseModule_3D (bn=False): TLU(Conv3d_replicate(x)).

    x:      (N, Cin, D, H, W)
    weight: (Cout, Cin, KD, KH, KW)  (odd kernel sizes, stride 1)
    bias/alpha/beta: (Cout,)
    """
    N, Cin, D, H, W = x.shape
    Cout, _, KD, KH, KW = weight.shape
    pd, ph, pw = (KD - 1) // 2, (KH - 1) // 2, (KW - 1) // 2
    PH, PW = H + 2 * ph, W + 2 * pw
    plane = PH * PW
    n_taps = KD * KH * KW
    off_tail = (KH - 1) * PW + (KW - 1)

    csize = jnp.dtype(compute_dtype).itemsize
    osize = jnp.dtype(out_dtype).itemsize
    Cin_p = max(_round_up(Cin, 8), 8)   # sublane-aligned contraction dim

    # ---- generation-aware depth tiling: largest tile fitting the VMEM budget,
    #      ragged (ceil-based) last tile allowed.
    budget = _vmem_budget_bytes()
    td = D
    while td > 1 and _tile_bytes(td, plane, pd, off_tail, Cin_p, Cout,
                                 n_taps, csize, osize) > budget:
        td -= 1
    if N == 1 and D > 1 and td >= D:
        td = _ceil_div(D, 2)            # >= 2 parallel grid steps (v7x: 2 TCs)
    n_dt = _ceil_div(D, td)

    T = td * plane
    Tp = _round_up(T, 128)
    e = _ceil_div((Tp - T) + off_tail, plane)   # extra planes for flat coverage
    dbox = td + 2 * pd + e
    F_flat = dbox * plane

    # ---- single producer pass: replicate halo + ragged-depth pad + Cin pad +
    #      flat-tail coverage (all edge mode), fused with the dtype cast.
    #      Padded Cin rows multiply zero weight columns; extra depth planes only
    #      feed discarded outputs.
    dp_back = (n_dt * td - D) + pd + e
    x_pad = jnp.pad(
        x, ((0, 0), (0, Cin_p - Cin), (pd, dp_back), (ph, ph), (pw, pw)),
        mode="edge").astype(compute_dtype)

    if n_dt == 1:
        x_tiles = x_pad.reshape(N, 1, Cin_p, F_flat)
    else:
        # TODO(synk): avoid this extra HBM pass with pl.ANY + make_async_copy.
        x_tiles = jnp.stack(
            [x_pad[:, :, t * td:t * td + dbox] for t in range(n_dt)], axis=1
        ).reshape(N, n_dt, Cin_p, F_flat)

    # per-tap weights: (n_taps, Cout, Cin_p), zero-padded along Cin.
    w_taps = weight.transpose(2, 3, 4, 0, 1).reshape(n_taps, Cout, Cin)
    w_taps = jnp.pad(w_taps, ((0, 0), (0, 0), (0, Cin_p - Cin)))
    w_taps = w_taps.astype(compute_dtype)

    # fused per-channel params [bias | alpha | beta]
    pab = jnp.stack([bias, alpha, beta], axis=1).astype(jnp.float32)

    offsets = tuple(kd * plane + kh * PW + kw
                    for kd in range(KD) for kh in range(KH) for kw in range(KW))

    kernel = functools.partial(_conv_tlu_kernel, cout=Cout, tp=Tp, offsets=offsets)

    out = pl.pallas_call(
        kernel,
        out_shape=jax.ShapeDtypeStruct((N, Cout, n_dt * Tp), out_dtype),
        grid_spec=pltpu.PrefetchScalarGridSpec(
            num_scalar_prefetch=0,
            grid=(N, n_dt),
            in_specs=[
                pl.BlockSpec((None, None, Cin_p, F_flat), lambda n, t: (n, t, 0, 0)),
                pl.BlockSpec((n_taps, Cout, Cin_p), lambda n, t: (0, 0, 0)),
                pl.BlockSpec((Cout, 3), lambda n, t: (0, 0)),
            ],
            out_specs=pl.BlockSpec((None, Cout, Tp), lambda n, t: (n, 0, t)),
        ),
        compiler_params=pltpu.CompilerParams(
            dimension_semantics=("parallel", "parallel"),
            vmem_limit_bytes=int(budget),
        ),
    )(x_tiles, w_taps, pab)

    # Drop lane padding, junk h/w columns and ragged depth — no transpose needed.
    out = out.reshape(N, Cout, n_dt, Tp)[..., :T]
    out = out.reshape(N, Cout, n_dt, td, PH, PW)[..., :H, :W]
    out = out.reshape(N, Cout, n_dt * td, H, W)[:, :, :D]
    return out


# -------------------- reference (pure JAX) for verification --------------------
def emnet_base_module_3d_ref(x, weight, bias, alpha, beta):
    Cout = weight.shape[0]
    KD, KH, KW = weight.shape[2:]
    pd, ph, pw = (KD - 1) // 2, (KH - 1) // 2, (KW - 1) // 2
    x_pad = jnp.pad(x, ((0, 0), (0, 0), (pd, pd), (ph, ph), (pw, pw)), mode="edge")
    y = lax.conv_general_dilated(
        x_pad, weight, window_strides=(1, 1, 1), padding="VALID",
        dimension_numbers=("NCDHW", "OIDHW", "NCDHW"),
    )
    y = y + bias.reshape(1, Cout, 1, 1, 1)
    a = alpha.reshape(1, Cout, 1, 1, 1)
    b = beta.reshape(1, Cout, 1, 1, 1)
    return jnp.where(y >= 0, b * y, a * y)


if __name__ == "__main__":
    key = jax.random.PRNGKey(0)
    k_x, k_w, k_b = jax.random.split(key, 3)

    # small shapes: batch=2, in_channels=4, out_channels=8, spatial 8^3
    N, Cin, Cout = 2, 4, 8
    D = H = W = 8

    x = jax.random.normal(k_x, (N, Cin, D, H, W), dtype=jnp.float32)
    weight = 0.1 * jax.random.normal(k_w, (Cout, Cin, 3, 3, 3), dtype=jnp.float32)
    bias = 0.05 * jax.random.normal(k_b, (Cout,), dtype=jnp.float32)
    # TLU defaults from the module: alpha_init=0.0, beta_init=1.0
    alpha = jnp.zeros((Cout,), dtype=jnp.float32)
    beta = jnp.ones((Cout,), dtype=jnp.float32)

    ref = jax.block_until_ready(
        emnet_base_module_3d_ref(x, weight, bias, alpha, beta))

    # f32 compute path: tight check against the reference.
    fwd_f32 = jax.jit(functools.partial(
        emnet_base_module_3d, compute_dtype=jnp.float32, out_dtype=jnp.float32))
    out_f32 = jax.block_until_ready(fwd_f32(x, weight, bias, alpha, beta))
    assert out_f32.shape == (N, Cout, D, H, W)
    assert jnp.allclose(out_f32, ref, rtol=1e-4, atol=1e-4), (
        float(jnp.max(jnp.abs(out_f32 - ref))))

    # bf16 compute path (halves HBM input traffic, native MXU dtype): loose check.
    fwd_bf16 = jax.jit(functools.partial(
        emnet_base_module_3d, compute_dtype=jnp.bfloat16, out_dtype=jnp.float32))
    out_bf16 = jax.block_until_ready(fwd_bf16(x, weight, bias, alpha, beta))
    assert out_bf16.shape == (N, Cout, D, H, W)
    assert jnp.allclose(out_bf16, ref, rtol=1e-1, atol=1e-1), (
        float(jnp.max(jnp.abs(out_bf16 - ref))))

    print("KERNEL_OK")
</pallas_src>

<mosaic_0001>
module attributes {stable_mosaic.version = 11 : i64} {
  func.func @_conv_tlu_kernel(%arg0: i32, %arg1: i32, %arg2: memref<1x1x8x1200xf32, #tpu.memory_space<vmem>>, %arg3: memref<27x8x8xf32, #tpu.memory_space<vmem>>, %arg4: memref<8x3xf32, #tpu.memory_space<vmem>>, %arg5: memref<1x8x896xf32, #tpu.memory_space<vmem>>) attributes {dimension_semantics = [#tpu.dimension_semantics<parallel>, #tpu.dimension_semantics<parallel>], iteration_bounds = array<i64: 2, 1>, scalar_prefetch = 0 : i64, scratch_operands = 0 : i64, tpu.core_type = #tpu.core_type<tc>, window_params = [{transform_indices = @transform_0, window_bounds = array<i64: 1, 1, 8, 1200>}, {pipeline_mode = #tpu.pipeline_mode<synchronous>, transform_indices = @transform_1, window_bounds = array<i64: 27, 8, 8>}, {pipeline_mode = #tpu.pipeline_mode<synchronous>, transform_indices = @transform_2, window_bounds = array<i64: 8, 3>}, {transform_indices = @transform_3, window_bounds = array<i64: 1, 8, 896>}]} {
    %c0 = arith.constant 0 : index
    %c0_0 = arith.constant 0 : index
    %0 = vector.load %arg4[%c0, %c0_0] : memref<8x3xf32, #tpu.memory_space<vmem>>, vector<8x1xf32>
    %c0_1 = arith.constant 0 : index
    %c1 = arith.constant 1 : index
    %1 = vector.load %arg4[%c0_1, %c1] : memref<8x3xf32, #tpu.memory_space<vmem>>, vector<8x1xf32>
    %c0_2 = arith.constant 0 : index
    %c2 = arith.constant 2 : index
    %2 = vector.load %arg4[%c0_2, %c2] : memref<8x3xf32, #tpu.memory_space<vmem>>, vector<8x1xf32>
    %3 = vector.shape_cast %0 : vector<8x1xf32> to vector<8x1xf32>
    %4 = vector.broadcast %3 : vector<8x1xf32> to vector<8x896xf32>
    %c0_3 = arith.constant 0 : index
    %c0_4 = arith.constant 0 : index
    %c0_5 = arith.constant 0 : index
    %5 = vector.load %arg3[%c0_3, %c0_4, %c0_5] : memref<27x8x8xf32, #tpu.memory_space<vmem>>, vector<1x8x8xf32>
    %6 = vector.shape_cast %5 : vector<1x8x8xf32> to vector<8x8xf32>
    %c0_6 = arith.constant 0 : index
    %c0_7 = arith.constant 0 : index
    %c0_8 = arith.constant 0 : index
    %c0_9 = arith.constant 0 : index
    %7 = vector.load %arg2[%c0_6, %c0_7, %c0_8, %c0_9] : memref<1x1x8x1200xf32, #tpu.memory_space<vmem>>, vector<1x1x8x896xf32>
    %8 = vector.shape_cast %7 : vector<1x1x8x896xf32> to vector<8x896xf32>
    %cst = arith.constant dense<0.000000e+00> : vector<8x896xf32>
    %9 = tpu.matmul %6, %8, %cst {dimension_numbers = #tpu.dot_dimension_numbers<[1], [0], [0], [1], [0, 0, 1, 1], [], []>} : vector<8x8xf32>, vector<8x896xf32>, vector<8x896xf32> -> vector<8x896xf32>
    %10 = arith.addf %4, %9 : vector<8x896xf32>
    %c1_10 = arith.constant 1 : index
    %c0_11 = arith.constant 0 : index
    %c0_12 = arith.constant 0 : index
    %11 = vector.load %arg3[%c1_10, %c0_11, %c0_12] : memref<27x8x8xf32, #tpu.memory_space<vmem>>, vector<1x8x8xf32>
    %12 = vector.shape_cast %11 : vector<1x8x8xf32> to vector<8x8xf32>
    %c0_13 = arith.constant 0 : index
    %c0_14 = arith.constant 0 : index
    %c0_15 = arith.constant 0 : index
    %c1_16 = arith.constant 1 : index
    %13 = vector.load %arg2[%c0_13, %c0_14, %c0_15, %c1_16] : memref<1x1x8x1200xf32, #tpu.memory_space<vmem>>, vector<1x1x8x896xf32>
    %14 = vector.shape_cast %13 : vector<1x1x8x896xf32> to vector<8x896xf32>
    %cst_17 = arith.constant dense<0.000000e+00> : vector<8x896xf32>
    %15 = tpu.matmul %12, %14, %cst_17 {dimension_numbers = #tpu.dot_dimension_numbers<[1], [0], [0], [1], [0, 0, 1, 1], [], []>} : vector<8x8xf32>, vector<8x896xf32>, vector<8x896xf32> -> vector<8x896xf32>
    %16 = arith.addf %10, %15 : vector<8x896xf32>
    %c2_18 = arith.constant 2 : index
    %c0_19 = arith.constant 0 : index
    %c0_20 = arith.constant 0 : index
    %17 = vector.load %arg3[%c2_18, %c0_19, %c0_20] : memref<27x8x8xf32, #tpu.memory_space<vmem>>, vector<1x8x8xf32>
    %18 = vector.shape_cast %17 : vector<1x8x8xf32> to vector<8x8xf32>
    %c0_21 = arith.constant 0 : index
    %c0_22 = arith.constant 0 : index
    %c0_23 = arith.constant 0 : index
    %c2_24 = arith.constant 2 : index
    %19 = vector.load %arg2[%c0_21, %c0_22, %c0_23, %c2_24] : memref<1x1x8x1200xf32, #tpu.memory_space<vmem>>, vector<1x1x8x896xf32>
    %20 = vector.shape_cast %19 : vector<1x1x8x896xf32> to vector<8x896xf32>
    %cst_25 = arith.constant dense<0.000000e+00> : vector<8x896xf32>
    %21 = tpu.matmul %18, %20, %cst_25 {dimension_numbers = #tpu.dot_dimension_numbers<[1], [0], [0], [1], [0, 0, 1, 1], [], []>} : vector<8x8xf32>, vector<8x896xf32>, vector<8x896xf32> -> vector<8x896xf32>
    %22 = arith.addf %16, %21 : vector<8x896xf32>
    %c3 = arith.constant 3 : index
    %c0_26 = arith.constant 0 : index
    %c0_27 = arith.constant 0 : index
    %23 = vector.load %arg3[%c3, %c0_26, %c0_27] : memref<27x8x8xf32, #tpu.memory_space<vmem>>, vector<1x8x8xf32>
    %24 = vector.shape_cast %23 : vector<1x8x8xf32> to vector<8x8xf32>
    %c0_28 = arith.constant 0 : index
    %c0_29 = arith.constant 0 : index
    %c0_30 = arith.constant 0 : index
    %c10 = arith.constant 10 : index
    %25 = vector.load %arg2[%c0_28, %c0_29, %c0_30, %c10] : memref<1x1x8x1200xf32, #tpu.memory_space<vmem>>, vector<1x1x8x896xf32>
    %26 = vector.shape_cast %25 : vector<1x1x8x896xf32> to vector<8x896xf32>
    %cst_31 = arith.constant dense<0.000000e+00> : vector<8x896xf32>
    %27 = tpu.matmul %24, %26, %cst_31 {dimension_numbers = #tpu.dot_dimension_numbers<[1], [0], [0], [1], [0, 0, 1, 1], [], []>} : vector<8x8xf32>, vector<8x896xf32>, vector<8x896xf32> -> vector<8x896xf32>
    %28 = arith.addf %22, %27 : vector<8x896xf32>
    %c4 = arith.constant 4 : index
    %c0_32 = arith.constant 0 : index
    %c0_33 = arith.constant 0 : index
    %29 = vector.load %arg3[%c4, %c0_32, %c0_33] : memref<27x8x8xf32, #tpu.memory_space<vmem>>, vector<1x8x8xf32>
    %30 = vector.shape_cast %29 : vector<1x8x8xf32> to vector<8x8xf32>
    %c0_34 = arith.constant 0 : index
    %c0_35 = arith.constant 0 : index
    %c0_36 = arith.constant 0 : index
    %c11 = arith.constant 11 : index
    %31 = vector.load %arg2[%c0_34, %c0_35, %c0_36, %c11] : memref<1x1x8x1200xf32, #tpu.memory_space<vmem>>, vector<1x1x8x896xf32>
    %32 = vector.shape_cast %31 : vector<1x1x8x896xf32> to vector<8x896xf32>
    %cst_37 = arith.constant dense<0.000000e+00> : vector<8x896xf32>
    %33 = tpu.matmul %30, %32, %cst_37 {dimension_numbers = #tpu.dot_dimension_numbers<[1], [0], [0], [1], [0, 0, 1, 1], [], []>} : vector<8x8xf32>, vector<8x896xf32>, vector<8x896xf32> -> vector<8x896xf32>
    %34 = arith.addf %28, %33 : vector<8x896xf32>
    %c5 = arith.constant 5 : index
    %c0_38 = arith.constant 0 : index
    %c0_39 = arith.constant 0 : index
    %35 = vector.load %arg3[%c5, %c0_38, %c0_39] : memref<27x8x8xf32, #tpu.memory_space<vmem>>, vector<1x8x8xf32>
    %36 = vector.shape_cast %35 : vector<1x8x8xf32> to vector<8x8xf32>
    %c0_40 = arith.constant 0 : index
    %c0_41 = arith.constant 0 : index
    %c0_42 = arith.constant 0 : index
    %c12 = arith.constant 12 : index
    %37 = vector.load %arg2[%c0_40, %c0_41, %c0_42, %c12] : memref<1x1x8x1200xf32, #tpu.memory_space<vmem>>, vector<1x1x8x896xf32>
    %38 = vector.shape_cast %37 : vector<1x1x8x896xf32> to vector<8x896xf32>
    %cst_43 = arith.constant dense<0.000000e+00> : vector<8x896xf32>
    %39 = tpu.matmul %36, %38, %cst_43 {dimension_numbers = #tpu.dot_dimension_numbers<[1], [0], [0], [1], [0, 0, 1, 1], [], []>} : vector<8x8xf32>, vector<8x896xf32>, vector<8x896xf32> -> vector<8x896xf32>
    %40 = arith.addf %34, %39 : vector<8x896xf32>
    %c6 = arith.constant 6 : index
    %c0_44 = arith.constant 0 : index
    %c0_45 = arith.constant 0 : index
    %41 = vector.load %arg3[%c6, %c0_44, %c0_45] : memref<27x8x8xf32, #tpu.memory_space<vmem>>, vector<1x8x8xf32>
    %42 = vector.shape_cast %41 : vector<1x8x8xf32> to vector<8x8xf32>
    %c0_46 = arith.constant 0 : index
    %c0_47 = arith.constant 0 : index
    %c0_48 = arith.constant 0 : index
    %c20 = arith.constant 20 : index
    %43 = vector.load %arg2[%c0_46, %c0_47, %c0_48, %c20] : memref<1x1x8x1200xf32, #tpu.memory_space<vmem>>, vector<1x1x8x896xf32>
    %44 = vector.shape_cast %43 : vector<1x1x8x896xf32> to vector<8x896xf32>
    %cst_49 = arith.constant dense<0.000000e+00> : vector<8x896xf32>
    %45 = tpu.matmul %42, %44, %cst_49 {dimension_numbers = #tpu.dot_dimension_numbers<[1], [0], [0], [1], [0, 0, 1, 1], [], []>} : vector<8x8xf32>, vector<8x896xf32>, vector<8x896xf32> -> vector<8x896xf32>
    %46 = arith.addf %40, %45 : vector<8x896xf32>
    %c7 = arith.constant 7 : index
    %c0_50 = arith.constant 0 : index
    %c0_51 = arith.constant 0 : index
    %47 = vector.load %arg3[%c7, %c0_50, %c0_51] : memref<27x8x8xf32, #tpu.memory_space<vmem>>, vector<1x8x8xf32>
    %48 = vector.shape_cast %47 : vector<1x8x8xf32> to vector<8x8xf32>
    %c0_52 = arith.constant 0 : index
    %c0_53 = arith.constant 0 : index
    %c0_54 = arith.constant 0 : index
    %c21 = arith.constant 21 : index
    %49 = vector.load %arg2[%c0_52, %c0_53, %c0_54, %c21] : memref<1x1x8x1200xf32, #tpu.memory_space<vmem>>, vector<1x1x8x896xf32>
    %50 = vector.shape_cast %49 : vector<1x1x8x896xf32> to vector<8x896xf32>
    %cst_55 = arith.constant dense<0.000000e+00> : vector<8x896xf32>
    %51 = tpu.matmul %48, %50, %cst_55 {dimension_numbers = #tpu.dot_dimension_numbers<[1], [0], [0], [1], [0, 0, 1, 1], [], []>} : vector<8x8xf32>, vector<8x896xf32>, vector<8x896xf32> -> vector<8x896xf32>
    %52 = arith.addf %46, %51 : vector<8x896xf32>
    %c8 = arith.constant 8 : index
    %c0_56 = arith.constant 0 : index
    %c0_57 = arith.constant 0 : index
    %53 = vector.load %arg3[%c8, %c0_56, %c0_57] : memref<27x8x8xf32, #tpu.memory_space<vmem>>, vector<1x8x8xf32>
    %54 = vector.shape_cast %53 : vector<1x8x8xf32> to vector<8x8xf32>
    %c0_58 = arith.constant 0 : index
    %c0_59 = arith.constant 0 : index
    %c0_60 = arith.constant 0 : index
    %c22 = arith.constant 22 : index
    %55 = vector.load %arg2[%c0_58, %c0_59, %c0_60, %c22] : memref<1x1x8x1200xf32, #tpu.memory_space<vmem>>, vector<1x1x8x896xf32>
    %56 = vector.shape_cast %55 : vector<1x1x8x896xf32> to vector<8x896xf32>
    %cst_61 = arith.constant dense<0.000000e+00> : vector<8x896xf32>
    %57 = tpu.matmul %54, %56, %cst_61 {dimension_numbers = #tpu.dot_dimension_numbers<[1], [0], [0], [1], [0, 0, 1, 1], [], []>} : vector<8x8xf32>, vector<8x896xf32>, vector<8x896xf32> -> vector<8x896xf32>
    %58 = arith.addf %52, %57 : vector<8x896xf32>
    %c9 = arith.constant 9 : index
    %c0_62 = arith.constant 0 : index
    %c0_63 = arith.constant 0 : index
    %59 = vector.load %arg3[%c9, %c0_62, %c0_63] : memref<27x8x8xf32, #tpu.memory_space<vmem>>, vector<1x8x8xf32>
    %60 = vector.shape_cast %59 : vector<1x8x8xf32> to vector<8x8xf32>
    %c0_64 = arith.constant 0 : index
    %c0_65 = arith.constant 0 : index
    %c0_66 = arith.constant 0 : index
    %c100 = arith.constant 100 : index
    %61 = vector.load %arg2[%c0_64, %c0_65, %c0_66, %c100] : memref<1x1x8x1200xf32, #tpu.memory_space<vmem>>, vector<1x1x8x896xf32>
    %62 = vector.shape_cast %61 : vector<1x1x8x896xf32> to vector<8x896xf32>
    %cst_67 = arith.constant dense<0.000000e+00> : vector<8x896xf32>
    %63 = tpu.matmul %60, %62, %cst_67 {dimension_numbers = #tpu.dot_dimension_numbers<[1], [0], [0], [1], [0, 0, 1, 1], [], []>} : vector<8x8xf32>, vector<8x896xf32>, vector<8x896xf32> -> vector<8x896xf32>
    %64 = arith.addf %58, %63 : vector<8x896xf32>
    %c10_68 = arith.constant 10 : index
    %c0_69 = arith.constant 0 : index
    %c0_70 = arith.constant 0 : index
    %65 = vector.load %arg3[%c10_68, %c0_69, %c0_70] : memref<27x8x8xf32, #tpu.memory_space<vmem>>, vector<1x8x8xf32>
    %66 = vector.shape_cast %65 : vector<1x8x8xf32> to vector<8x8xf32>
    %c0_71 = arith.constant 0 : index
    %c0_72 = arith.constant 0 : index
    %c0_73 = arith.constant 0 : index
    %c101 = arith.constant 101 : index
    %67 = vector.load %arg2[%c0_71, %c0_72, %c0_73, %c101] : memref<1x1x8x1200xf32, #tpu.memory_space<vmem>>, vector<1x1x8x896xf32>
    %68 = vector.shape_cast %67 : vector<1x1x8x896xf32> to vector<8x896xf32>
    %cst_74 = arith.constant dense<0.000000e+00> : vector<8x896xf32>
    %69 = tpu.matmul %66, %68, %cst_74 {dimension_numbers = #tpu.dot_dimension_numbers<[1], [0], [0], [1], [0, 0, 1, 1], [], []>} : vector<8x8xf32>, vector<8x896xf32>, vector<8x896xf32> -> vector<8x896xf32>
    %70 = arith.addf %64, %69 : vector<8x896xf32>
    %c11_75 = arith.constant 11 : index
    %c0_76 = arith.constant 0 : index
    %c0_77 = arith.constant 0 : index
    %71 = vector.load %arg3[%c11_75, %c0_76, %c0_77] : memref<27x8x8xf32, #tpu.memory_space<vmem>>, vector<1x8x8xf32>
    %72 = vector.shape_cast %71 : vector<1x8x8xf32> to vector<8x8xf32>
    %c0_78 = arith.constant 0 : index
    %c0_79 = arith.constant 0 : index
    %c0_80 = arith.constant 0 : index
    %c102 = arith.constant 102 : index
    %73 = vector.load %arg2[%c0_78, %c0_79, %c0_80, %c102] : memref<1x1x8x1200xf32, #tpu.memory_space<vmem>>, vector<1x1x8x896xf32>
    %74 = vector.shape_cast %73 : vector<1x1x8x896xf32> to vector<8x896xf32>
    %cst_81 = arith.constant dense<0.000000e+00> : vector<8x896xf32>
    %75 = tpu.matmul %72, %74, %cst_81 {dimension_numbers = #tpu.dot_dimension_numbers<[1], [0], [0], [1], [0, 0, 1, 1], [], []>} : vector<8x8xf32>, vector<8x896xf32>, vector<8x896xf32> -> vector<8x896xf32>
    %76 = arith.addf %70, %75 : vector<8x896xf32>
    %c12_82 = arith.constant 12 : index
    %c0_83 = arith.constant 0 : index
    %c0_84 = arith.constant 0 : index
    %77 = vector.load %arg3[%c12_82, %c0_83, %c0_84] : memref<27x8x8xf32, #tpu.memory_space<vmem>>, vector<1x8x8xf32>
    %78 = vector.shape_cast %77 : vector<1x8x8xf32> to vector<8x8xf32>
    %c0_85 = arith.constant 0 : index
    %c0_86 = arith.constant 0 : index
    %c0_87 = arith.constant 0 : index
    %c110 = arith.constant 110 : index
    %79 = vector.load %arg2[%c0_85, %c0_86, %c0_87, %c110] : memref<1x1x8x1200xf32, #tpu.memory_space<vmem>>, vector<1x1x8x896xf32>
    %80 = vector.shape_cast %79 : vector<1x1x8x896xf32> to vector<8x896xf32>
    %cst_88 = arith.constant dense<0.000000e+00> : vector<8x896xf32>
    %81 = tpu.matmul %78, %80, %cst_88 {dimension_numbers = #tpu.dot_dimension_numbers<[1], [0], [0], [1], [0, 0, 1, 1], [], []>} : vector<8x8xf32>, vector<8x896xf32>, vector<8x896xf32> -> vector<8x896xf32>
    %82 = arith.addf %76, %81 : vector<8x896xf32>
    %c13 = arith.constant 13 : index
    %c0_89 = arith.constant 0 : index
    %c0_90 = arith.constant 0 : index
    %83 = vector.load %arg3[%c13, %c0_89, %c0_90] : memref<27x8x8xf32, #tpu.memory_space<vmem>>, vector<1x8x8xf32>
    %84 = vector.shape_cast %83 : vector<1x8x8xf32> to vector<8x8xf32>
    %c0_91 = arith.constant 0 : index
    %c0_92 = arith.constant 0 : index
    %c0_93 = arith.constant 0 : index
    %c111 = arith.constant 111 : index
    %85 = vector.load %arg2[%c0_91, %c0_92, %c0_93, %c111] : memref<1x1x8x1200xf32, #tpu.memory_space<vmem>>, vector<1x1x8x896xf32>
    %86 = vector.shape_cast %85 : vector<1x1x8x896xf32> to vector<8x896xf32>
    %cst_94 = arith.constant dense<0.000000e+00> : vector<8x896xf32>
    %87 = tpu.matmul %84, %86, %cst_94 {dimension_numbers = #tpu.dot_dimension_numbers<[1], [0], [0], [1], [0, 0, 1, 1], [], []>} : vector<8x8xf32>, vector<8x896xf32>, vector<8x896xf32> -> vector<8x896xf32>
    %88 = arith.addf %82, %87 : vector<8x896xf32>
    %c14 = arith.constant 14 : index
    %c0_95 = arith.constant 0 : index
    %c0_96 = arith.constant 0 : index
    %89 = vector.load %arg3[%c14, %c0_95, %c0_96] : memref<27x8x8xf32, #tpu.memory_space<vmem>>, vector<1x8x8xf32>
    %90 = vector.shape_cast %89 : vector<1x8x8xf32> to vector<8x8xf32>
    %c0_97 = arith.constant 0 : index
    %c0_98 = arith.constant 0 : index
    %c0_99 = arith.constant 0 : index
    %c112 = arith.constant 112 : index
    %91 = vector.load %arg2[%c0_97, %c0_98, %c0_99, %c112] : memref<1x1x8x1200xf32, #tpu.memory_space<vmem>>, vector<1x1x8x896xf32>
    %92 = vector.shape_cast %91 : vector<1x1x8x896xf32> to vector<8x896xf32>
    %cst_100 = arith.constant dense<0.000000e+00> : vector<8x896xf32>
    %93 = tpu.matmul %90, %92, %cst_100 {dimension_numbers = #tpu.dot_dimension_numbers<[1], [0], [0], [1], [0, 0, 1, 1], [], []>} : vector<8x8xf32>, vector<8x896xf32>, vector<8x896xf32> -> vector<8x896xf32>
    %94 = arith.addf %88, %93 : vector<8x896xf32>
    %c15 = arith.constant 15 : index
    %c0_101 = arith.constant 0 : index
    %c0_102 = arith.constant 0 : index
    %95 = vector.load %arg3[%c15, %c0_101, %c0_102] : memref<27x8x8xf32, #tpu.memory_space<vmem>>, vector<1x8x8xf32>
    %96 = vector.shape_cast %95 : vector<1x8x8xf32> to vector<8x8xf32>
    %c0_103 = arith.constant 0 : index
    %c0_104 = arith.constant 0 : index
    %c0_105 = arith.constant 0 : index
    %c120 = arith.constant 120 : index
    %97 = vector.load %arg2[%c0_103, %c0_104, %c0_105, %c120] : memref<1x1x8x1200xf32, #tpu.memory_space<vmem>>, vector<1x1x8x896xf32>
    %98 = vector.shape_cast %97 : vector<1x1x8x896xf32> to vector<8x896xf32>
    %cst_106 = arith.constant dense<0.000000e+00> : vector<8x896xf32>
    %99 = tpu.matmul %96, %98, %cst_106 {dimension_numbers = #tpu.dot_dimension_numbers<[1], [0], [0], [1], [0, 0, 1, 1], [], []>} : vector<8x8xf32>, vector<8x896xf32>, vector<8x896xf32> -> vector<8x896xf32>
    %100 = arith.addf %94, %99 : vector<8x896xf32>
    %c16 = arith.constant 16 : index
    %c0_107 = arith.constant 0 : index
    %c0_108 = arith.constant 0 : index
    %101 = vector.load %arg3[%c16, %c0_107, %c0_108] : memref<27x8x8xf32, #tpu.memory_space<vmem>>, vector<1x8x8xf32>
    %102 = vector.shape_cast %101 : vector<1x8x8xf32> to vector<8x8xf32>
    %c0_109 = arith.constant 0 : index
    %c0_110 = arith.constant 0 : index
    %c0_111 = arith.constant 0 : index
    %c121 = arith.constant 121 : index
    %103 = vector.load %arg2[%c0_109, %c0_110, %c0_111, %c121] : memref<1x1x8x1200xf32, #tpu.memory_space<vmem>>, vector<1x1x8x896xf32>
    %104 = vector.shape_cast %103 : vector<1x1x8x896xf32> to vector<8x896xf32>
    %cst_112 = arith.constant dense<0.000000e+00> : vector<8x896xf32>
    %105 = tpu.matmul %102, %104, %cst_112 {dimension_numbers = #tpu.dot_dimension_numbers<[1], [0], [0], [1], [0, 0, 1, 1], [], []>} : vector<8x8xf32>, vector<8x896xf32>, vector<8x896xf32> -> vector<8x896xf32>
    %106 = arith.addf %100, %105 : vector<8x896xf32>
    %c17 = arith.constant 17 : index
    %c0_113 = arith.constant 0 : index
    %c0_114 = arith.constant 0 : index
    %107 = vector.load %arg3[%c17, %c0_113, %c0_114] : memref<27x8x8xf32, #tpu.memory_space<vmem>>, vector<1x8x8xf32>
    %108 = vector.shape_cast %107 : vector<1x8x8xf32> to vector<8x8xf32>
    %c0_115 = arith.constant 0 : index
    %c0_116 = arith.constant 0 : index
    %c0_117 = arith.constant 0 : index
    %c122 = arith.constant 122 : index
    %109 = vector.load %arg2[%c0_115, %c0_116, %c0_117, %c122] : memref<1x1x8x1200xf32, #tpu.memory_space<vmem>>, vector<1x1x8x896xf32>
    %110 = vector.shape_cast %109 : vector<1x1x8x896xf32> to vector<8x896xf32>
    %cst_118 = arith.constant dense<0.000000e+00> : vector<8x896xf32>
    %111 = tpu.matmul %108, %110, %cst_118 {dimension_numbers = #tpu.dot_dimension_numbers<[1], [0], [0], [1], [0, 0, 1, 1], [], []>} : vector<8x8xf32>, vector<8x896xf32>, vector<8x896xf32> -> vector<8x896xf32>
    %112 = arith.addf %106, %111 : vector<8x896xf32>
    %c18 = arith.constant 18 : index
    %c0_119 = arith.constant 0 : index
    %c0_120 = arith.constant 0 : index
    %113 = vector.load %arg3[%c18, %c0_119, %c0_120] : memref<27x8x8xf32, #tpu.memory_space<vmem>>, vector<1x8x8xf32>
    %114 = vector.shape_cast %113 : vector<1x8x8xf32> to vector<8x8xf32>
    %c0_121 = arith.constant 0 : index
    %c0_122 = arith.constant 0 : index
    %c0_123 = arith.constant 0 : index
    %c200 = arith.constant 200 : index
    %115 = vector.load %arg2[%c0_121, %c0_122, %c0_123, %c200] : memref<1x1x8x1200xf32, #tpu.memory_space<vmem>>, vector<1x1x8x896xf32>
    %116 = vector.shape_cast %115 : vector<1x1x8x896xf32> to vector<8x896xf32>
    %cst_124 = arith.constant dense<0.000000e+00> : vector<8x896xf32>
    %117 = tpu.matmul %114, %116, %cst_124 {dimension_numbers = #tpu.dot_dimension_numbers<[1], [0], [0], [1], [0, 0, 1, 1], [], []>} : vector<8x8xf32>, vector<8x896xf32>, vector<8x896xf32> -> vector<8x896xf32>
    %118 = arith.addf %112, %117 : vector<8x896xf32>
    %c19 = arith.constant 19 : index
    %c0_125 = arith.constant 0 : index
    %c0_126 = arith.constant 0 : index
    %119 = vector.load %arg3[%c19, %c0_125, %c0_126] : memref<27x8x8xf32, #tpu.memory_space<vmem>>, vector<1x8x8xf32>
    %120 = vector.shape_cast %119 : vector<1x8x8xf32> to vector<8x8xf32>
    %c0_127 = arith.constant 0 : index
    %c0_128 = arith.constant 0 : index
    %c0_129 = arith.constant 0 : index
    %c201 = arith.constant 201 : index
    %121 = vector.load %arg2[%c0_127, %c0_128, %c0_129, %c201] : memref<1x1x8x1200xf32, #tpu.memory_space<vmem>>, vector<1x1x8x896xf32>
    %122 = vector.shape_cast %121 : vector<1x1x8x896xf32> to vector<8x896xf32>
    %cst_130 = arith.constant dense<0.000000e+00> : vector<8x896xf32>
    %123 = tpu.matmul %120, %122, %cst_130 {dimension_numbers = #tpu.dot_dimension_numbers<[1], [0], [0], [1], [0, 0, 1, 1], [], []>} : vector<8x8xf32>, vector<8x896xf32>, vector<8x896xf32> -> vector<8x896xf32>
    %124 = arith.addf %118, %123 : vector<8x896xf32>
    %c20_131 = arith.constant 20 : index
    %c0_132 = arith.constant 0 : index
    %c0_133 = arith.constant 0 : index
    %125 = vector.load %arg3[%c20_131, %c0_132, %c0_133] : memref<27x8x8xf32, #tpu.memory_space<vmem>>, vector<1x8x8xf32>
    %126 = vector.shape_cast %125 : vector<1x8x8xf32> to vector<8x8xf32>
    %c0_134 = arith.constant 0 : index
    %c0_135 = arith.constant 0 : index
    %c0_136 = arith.constant 0 : index
    %c202 = arith.constant 202 : index
    %127 = vector.load %arg2[%c0_134, %c0_135, %c0_136, %c202] : memref<1x1x8x1200xf32, #tpu.memory_space<vmem>>, vector<1x1x8x896xf32>
    %128 = vector.shape_cast %127 : vector<1x1x8x896xf32> to vector<8x896xf32>
    %cst_137 = arith.constant dense<0.000000e+00> : vector<8x896xf32>
    %129 = tpu.matmul %126, %128, %cst_137 {dimension_numbers = #tpu.dot_dimension_numbers<[1], [0], [0], [1], [0, 0, 1, 1], [], []>} : vector<8x8xf32>, vector<8x896xf32>, vector<8x896xf32> -> vector<8x896xf32>
    %130 = arith.addf %124, %129 : vector<8x896xf32>
    %c21_138 = arith.constant 21 : index
    %c0_139 = arith.constant 0 : index
    %c0_140 = arith.constant 0 : index
    %131 = vector.load %arg3[%c21_138, %c0_139, %c0_140] : memref<27x8x8xf32, #tpu.memory_space<vmem>>, vector<1x8x8xf32>
    %132 = vector.shape_cast %131 : vector<1x8x8xf32> to vector<8x8xf32>
    %c0_141 = arith.constant 0 : index
    %c0_142 = arith.constant 0 : index
    %c0_143 = arith.constant 0 : index
    %c210 = arith.constant 210 : index
    %133 = vector.load %arg2[%c0_141, %c0_142, %c0_143, %c210] : memref<1x1x8x1200xf32, #tpu.memory_space<vmem>>, vector<1x1x8x896xf32>
    %134 = vector.shape_cast %133 : vector<1x1x8x896xf32> to vector<8x896xf32>
    %cst_144 = arith.constant dense<0.000000e+00> : vector<8x896xf32>
    %135 = tpu.matmul %132, %134, %cst_144 {dimension_numbers = #tpu.dot_dimension_numbers<[1], [0], [0], [1], [0, 0, 1, 1], [], []>} : vector<8x8xf32>, vector<8x896xf32>, vector<8x896xf32> -> vector<8x896xf32>
    %136 = arith.addf %130, %135 : vector<8x896xf32>
    %c22_145 = arith.constant 22 : index
    %c0_146 = arith.constant 0 : index
    %c0_147 = arith.constant 0 : index
    %137 = vector.load %arg3[%c22_145, %c0_146, %c0_147] : memref<27x8x8xf32, #tpu.memory_space<vmem>>, vector<1x8x8xf32>
    %138 = vector.shape_cast %137 : vector<1x8x8xf32> to vector<8x8xf32>
    %c0_148 = arith.constant 0 : index
    %c0_149 = arith.constant 0 : index
    %c0_150 = arith.constant 0 : index
    %c211 = arith.constant 211 : index
    %139 = vector.load %arg2[%c0_148, %c0_149, %c0_150, %c211] : memref<1x1x8x1200xf32, #tpu.memory_space<vmem>>, vector<1x1x8x896xf32>
    %140 = vector.shape_cast %139 : vector<1x1x8x896xf32> to vector<8x896xf32>
    %cst_151 = arith.constant dense<0.000000e+00> : vector<8x896xf32>
    %141 = tpu.matmul %138, %140, %cst_151 {dimension_numbers = #tpu.dot_dimension_numbers<[1], [0], [0], [1], [0, 0, 1, 1], [], []>} : vector<8x8xf32>, vector<8x896xf32>, vector<8x896xf32> -> vector<8x896xf32>
    %142 = arith.addf %136, %141 : vector<8x896xf32>
    %c23 = arith.constant 23 : index
    %c0_152 = arith.constant 0 : index
    %c0_153 = arith.constant 0 : index
    %143 = vector.load %arg3[%c23, %c0_152, %c0_153] : memref<27x8x8xf32, #tpu.memory_space<vmem>>, vector<1x8x8xf32>
    %144 = vector.shape_cast %143 : vector<1x8x8xf32> to vector<8x8xf32>
    %c0_154 = arith.constant 0 : index
    %c0_155 = arith.constant 0 : index
    %c0_156 = arith.constant 0 : index
    %c212 = arith.constant 212 : index
    %145 = vector.load %arg2[%c0_154, %c0_155, %c0_156, %c212] : memref<1x1x8x1200xf32, #tpu.memory_space<vmem>>, vector<1x1x8x896xf32>
    %146 = vector.shape_cast %145 : vector<1x1x8x896xf32> to vector<8x896xf32>
    %cst_157 = arith.constant dense<0.000000e+00> : vector<8x896xf32>
    %147 = tpu.matmul %144, %146, %cst_157 {dimension_numbers = #tpu.dot_dimension_numbers<[1], [0], [0], [1], [0, 0, 1, 1], [], []>} : vector<8x8xf32>, vector<8x896xf32>, vector<8x896xf32> -> vector<8x896xf32>
    %148 = arith.addf %142, %147 : vector<8x896xf32>
    %c24 = arith.constant 24 : index
    %c0_158 = arith.constant 0 : index
    %c0_159 = arith.constant 0 : index
    %149 = vector.load %arg3[%c24, %c0_158, %c0_159] : memref<27x8x8xf32, #tpu.memory_space<vmem>>, vector<1x8x8xf32>
    %150 = vector.shape_cast %149 : vector<1x8x8xf32> to vector<8x8xf32>
    %c0_160 = arith.constant 0 : index
    %c0_161 = arith.constant 0 : index
    %c0_162 = arith.constant 0 : index
    %c220 = arith.constant 220 : index
    %151 = vector.load %arg2[%c0_160, %c0_161, %c0_162, %c220] : memref<1x1x8x1200xf32, #tpu.memory_space<vmem>>, vector<1x1x8x896xf32>
    %152 = vector.shape_cast %151 : vector<1x1x8x896xf32> to vector<8x896xf32>
    %cst_163 = arith.constant dense<0.000000e+00> : vector<8x896xf32>
    %153 = tpu.matmul %150, %152, %cst_163 {dimension_numbers = #tpu.dot_dimension_numbers<[1], [0], [0], [1], [0, 0, 1, 1], [], []>} : vector<8x8xf32>, vector<8x896xf32>, vector<8x896xf32> -> vector<8x896xf32>
    %154 = arith.addf %148, %153 : vector<8x896xf32>
    %c25 = arith.constant 25 : index
    %c0_164 = arith.constant 0 : index
    %c0_165 = arith.constant 0 : index
    %155 = vector.load %arg3[%c25, %c0_164, %c0_165] : memref<27x8x8xf32, #tpu.memory_space<vmem>>, vector<1x8x8xf32>
    %156 = vector.shape_cast %155 : vector<1x8x8xf32> to vector<8x8xf32>
    %c0_166 = arith.constant 0 : index
    %c0_167 = arith.constant 0 : index
    %c0_168 = arith.constant 0 : index
    %c221 = arith.constant 221 : index
    %157 = vector.load %arg2[%c0_166, %c0_167, %c0_168, %c221] : memref<1x1x8x1200xf32, #tpu.memory_space<vmem>>, vector<1x1x8x896xf32>
    %158 = vector.shape_cast %157 : vector<1x1x8x896xf32> to vector<8x896xf32>
    %cst_169 = arith.constant dense<0.000000e+00> : vector<8x896xf32>
    %159 = tpu.matmul %156, %158, %cst_169 {dimension_numbers = #tpu.dot_dimension_numbers<[1], [0], [0], [1], [0, 0, 1, 1], [], []>} : vector<8x8xf32>, vector<8x896xf32>, vector<8x896xf32> -> vector<8x896xf32>
    %160 = arith.addf %154, %159 : vector<8x896xf32>
    %c26 = arith.constant 26 : index
    %c0_170 = arith.constant 0 : index
    %c0_171 = arith.constant 0 : index
    %161 = vector.load %arg3[%c26, %c0_170, %c0_171] : memref<27x8x8xf32, #tpu.memory_space<vmem>>, vector<1x8x8xf32>
    %162 = vector.shape_cast %161 : vector<1x8x8xf32> to vector<8x8xf32>
    %c0_172 = arith.constant 0 : index
    %c0_173 = arith.constant 0 : index
    %c0_174 = arith.constant 0 : index
    %c222 = arith.constant 222 : index
    %163 = vector.load %arg2[%c0_172, %c0_173, %c0_174, %c222] : memref<1x1x8x1200xf32, #tpu.memory_space<vmem>>, vector<1x1x8x896xf32>
    %164 = vector.shape_cast %163 : vector<1x1x8x896xf32> to vector<8x896xf32>
    %cst_175 = arith.constant dense<0.000000e+00> : vector<8x896xf32>
    %165 = tpu.matmul %162, %164, %cst_175 {dimension_numbers = #tpu.dot_dimension_numbers<[1], [0], [0], [1], [0, 0, 1, 1], [], []>} : vector<8x8xf32>, vector<8x896xf32>, vector<8x896xf32> -> vector<8x896xf32>
    %166 = arith.addf %160, %165 : vector<8x896xf32>
    %cst_176 = arith.constant 0.000000e+00 : f32
    %167 = vector.broadcast %cst_176 : f32 to vector<8x896xf32>
    %168 = arith.cmpf oge, %166, %167 : vector<8x896xf32>
    %169 = vector.broadcast %2 : vector<8x1xf32> to vector<8x896xf32>
    %170 = arith.mulf %169, %166 : vector<8x896xf32>
    %171 = vector.broadcast %1 : vector<8x1xf32> to vector<8x896xf32>
    %172 = arith.mulf %171, %166 : vector<8x896xf32>
    %173 = arith.select %168, %170, %172 : vector<8x896xi1>, vector<8x896xf32>
    %c0_177 = arith.constant 0 : index
    %c0_178 = arith.constant 0 : index
    %c0_179 = arith.constant 0 : index
    %174 = vector.load %arg5[%c0_177, %c0_178, %c0_179] : memref<1x8x896xf32, #tpu.memory_space<vmem>>, vector<1x8x896xf32>
    %175 = vector.shape_cast %174 : vector<1x8x896xf32> to vector<8x896xf32>
    %176 = vector.shape_cast %173 : vector<8x896xf32> to vector<1x8x896xf32>
    tpu.vector_store %arg5[%c0_177, %c0_178, %c0_179], %176 {strides = array<i32>} : memref<1x8x896xf32, #tpu.memory_space<vmem>>, vector<1x8x896xf32>,
    return
  }
  func.func @transform_0(%arg0: i32, %arg1: i32) -> (i32, i32, i32, i32) {
    %c0_i32 = arith.constant 0 : i32
    %c0_i32_0 = arith.constant 0 : i32
    %c0_i32_1 = arith.constant 0 : i32
    return %arg0, %arg1, %c0_i32, %c0_i32_0 : i32, i32, i32, i32
  }
  func.func @transform_1(%arg0: i32, %arg1: i32) -> (i32, i32, i32) {
    %c0_i32 = arith.constant 0 : i32
    %c0_i32_0 = arith.constant 0 : i32
    %c0_i32_1 = arith.constant 0 : i32
    %c0_i32_2 = arith.constant 0 : i32
    return %c0_i32, %c0_i32_0, %c0_i32_1 : i32, i32, i32
  }
  func.func @transform_2(%arg0: i32, %arg1: i32) -> (i32, i32) {
    %c0_i32 = arith.constant 0 : i32
    %c0_i32_0 = arith.constant 0 : i32
    %c0_i32_1 = arith.constant 0 : i32
    return %c0_i32, %c0_i32_0 : i32, i32
  }
  func.func @transform_3(%arg0: i32, %arg1: i32) -> (i32, i32, i32) {
    %c0_i32 = arith.constant 0 : i32
    %c0_i32_0 = arith.constant 0 : i32
    return %arg0, %c0_i32, %arg1 : i32, i32, i32
  }
}

</mosaic_0001>

<bundles_post_ra>
// kernel: emnet_base_module_3d.1
= control target key start
LH: loop header
LB: loop body
LE: loop exit
PB: predicated region body
PF: predicated region fallthrough
CT: control target
= control target key end

     0   :  { %s9841_s12 = smov 0   ;;  %s9843_s13 = smov 0   ;;  %s10840_s0 = inlined_call_operand.vmem [shape: f32[2,1,8,1200], index: 0, kind: input, shape index: {}]   ;;  %s10841_s1 = inlined_call_operand.vmem [shape: f32[27,8,8], index: 1, kind: input, shape index: {}]   ;;  %s10842_s2 = inlined_call_operand.vmem [shape: f32[8,3], index: 2, kind: input, shape index: {}]   ;;  %s10843_s3 = inlined_call_operand.vmem [shape: f32[2,8,896], index: 3, kind: output, shape index: {}]  }
   0x1   :  { %s9845_s14 = smov 0  }
   0x2 LB: > { %s25_s15 = sadd.s32 1, %s9784_s13  ;;  %p9160_p0 = scmp.ge.s32.totalorder %s9788_s14, 1  ;;  %s9788_s14 = sphi %s9845_s14, %s13_s14   ;;  %s9784_s13 = sphi %s9843_s13, %s10845_s13   ;;  %s9780_s12 = sphi %s9841_s12, %s10844_s12  }
   0x3   : > { %p27_p1 = scmp.ge.s32.totalorder %s25_s15, 2  ;;  %p157_p2 = scmp.lt.s32.totalorder %s9788_s14, 3 }
   0x5   : > { %s10847_s15 = smov (%p27_p1, %s25_s15), 0  ;;  %p158_p3 = pnand %p9160_p0, %p157_p2 }
   0x6   : > { %p189_p4 = scmp.lt.s32.totalorder (!%p158_p3), %s9780_s12, 1  ;;  %v9790_v0 = vmov (!%p158_p3), 0.0   ;;  %s9791_s20 = smov (!%p158_p3), 127   ;;  %v214_v4 = vld [vmem:[%s10841_s1] sm:$0xff] (!%p158_p3)  ;;  %vm222_vm0 = vcmask (!%p158_p3), 64512   ;;  %vm9792_vm1 = vmmov (!%p158_p3), 0  }
   0x7   : > { %161 = sbr.rel (%p158_p3) target bundleno = 769 (0x301), region = 32  ;;  %290 = vmatprep.mubr.f32.mxu0 (!%p158_p3), %v9790_v0  ;;  %361 = vmatprep.mubr.f32.mxu1 (!%p158_p3), %v9790_v0  ;;  %s9793_s23 = smov (!%p158_p3), 126   ;;  %vm550_vm2 = vcmask (!%p158_p3), 1039360   ;;  %v9167_v15 = vld [vmem:[%s10841_s1 + $0x8] sm:$0xff] (!%p158_p3)  ;;  %vm876_vm3 = vcmask (!%p158_p3), 1031168   ;;  %v9172_v32 = vld [vmem:[%s10841_s1 + $0x10] sm:$0xff] (!%p158_p3) }
   0x8   : > { %s9794_s24 = smov (!%p158_p3), 118   ;;  %s9795_s25 = smov (!%p158_p3), 117   ;;  %vm1202_vm4 = vcmask (!%p158_p3), 965632   ;;  %v9177_v48 = vld [vmem:[%s10841_s1 + $0x18] sm:$0xff] (!%p158_p3)  ;;  %vm1528_vm5 = vcmask (!%p158_p3), 957440   ;;  %vm1854_vm6 = vcmask (!%p158_p3), 949248  }
   0x9   : > { %s9796_s26 = smov (!%p158_p3), 116   ;;  %s9797_s27 = smov (!%p158_p3), 108   ;;  %vm2180_vm7 = vcmask (!%p158_p3), 883712   ;;  %vm2506_vm8 = vcmask (!%p158_p3), 875520   ;;  %vm2832_vm9 = vcmask (!%p158_p3), 867328   ;;  %vm3158_vm10 = vcmask (!%p158_p3), 228352  }
   0xa   : > { %s9798_s28 = smov (!%p158_p3), 107   ;;  %s9799_s29 = smov (!%p158_p3), 106   ;;  %vm3484_vm11 = vcmask (!%p158_p3), 220160   ;;  %vm3810_vm12 = vcmask (!%p158_p3), 211968   ;;  %vm4136_vm13 = vcmask (!%p158_p3), 146432   ;;  %vm4462_vm14 = vcmask (!%p158_p3), 138240  }
   0xb   : > { %s9800_s5 = smov (!%p158_p3), 28   ;;  %s9801_s8 = smov (!%p158_p3), 27   ;;  %vm4788_vm15 = vcmask (!%p158_p3), 130048  }
   0xc   : > { %s9802_s11 = smov (!%p158_p3), 26   ;;  %s9803_s18 = smov (!%p158_p3), 18  }
   0xd   : > { %s9804_s22 = smov (!%p158_p3), 17   ;;  %s9807_s4 = smov (!%p158_p3), 7  }
   0xe   : > { %s10849_s12 = smov (!%p189_p4, %s9780_s12), 1  ;;  %s9808_s7 = smov 6  }
   0xf   : > { %s9703_s16 = smul.u32 80, %s10849_s12  ;;  %s9809_s10 = smov 56  }
  0x10   : > { %s9810_s17 = smov 55  }
  0x11   : > { %s9867_s19 = scalar_lea.vmem %s10840_s0, %s9703_s16 }
  0x12   : > { %v9870_v1 = vld [vmem:[%s9867_s19 + $0x8] sm:$0xff]  ;;  %v9873_v2 = vld [vmem:[%s9867_s19] sm:$0xff]  ;;  %v9880_v3 = vld [vmem:[%s9867_s19 + $0x18] sm:$0xff] }
  0x13   : > { %536 = vrot.lane.b32.xlu0 %v9870_v1, %s9791_s20  ;;  %534 = vrot.lane.b32.xlu1 %v9873_v2, %s9791_s20  ;;  %v9886_v5 = vld [vmem:[%s9867_s19 + $0x10] sm:$0xff]  ;;  %v9891_v6 = vld [vmem:[%s9867_s19 + $0x28] sm:$0xff] }
  0x14   : > { %226 = vmatprep.subr.mxu0 %v9870_v1  ;;  %297 = vmatprep.subr.mxu1 %v9880_v3  ;;  %v9902_v7 = vld [vmem:[%s9867_s19 + $0x20] sm:$0xff]  ;;  %v9907_v8 = vld [vmem:[%s9867_s19 + $0x30] sm:$0xff]  ;;  %v9918_v9 = vld [vmem:[%s9867_s19 + $0x38] sm:$0xff] }
  0x15   : > { %227 = vmatpush1.msra.mxu0 %v9873_v2  ;;  %298 = vmatpush1.msra.mxu1 %v9886_v5 }
  0x16   : > { %9163 = vmatmul.mubr.msk.f32.vlgmr.msra.gmra.mrb[0].mxu0 %vm222_vm0, %v214_v4  ;;  %368 = vmatprep.subr.mxu0 %v9891_v6 }
  0x17   : > { %538 = vrot.lane.b32.xlu0 %v9886_v5, %s9791_s20  ;;  %540 = vrot.lane.b32.xlu1 %v9880_v3, %s9791_s20 }
  0x18   : > { %369 = vmatpush1.msra.mxu0 %v9902_v7  ;;  %9164 = vmatmul.mubr.msk.f32.vlgmr.msra.gmra.mrb[0].mxu1 %vm222_vm0, %v214_v4 }
  0x19   : > { %432 = vmatprep.mubr.f32.mxu0 %v9790_v0  ;;  %9353 = vmatprep.subr.mxu1 %v9790_v0 }
  0x1a   : > { %9165 = vmatmul.mubr.msk.f32.vlgmr.msra.gmra.mrb[2].mxu0 %vm222_vm0, %v214_v4  ;;  %9354 = vmatpush3.msra.mxu1 %v9907_v8 }
  0x1b   : > { %542 = vrot.lane.b32.xlu0 %v9902_v7, %s9791_s20  ;;  %544 = vrot.lane.b32.xlu1 %v9891_v6, %s9791_s20 }
  0x1c   : > { %9355 = vmatprep.mubr.msk.f32.mxu1 %vm9792_vm1, %v9790_v0  ;;  %632 = vmatprep.mubr.f32.mxu0 %v9790_v0 }
  0x1d   : > { %9356 = vmatmul.mubr.msk.f32.vlgmr.msra.gmra.mrb[2].mxu1 %vm222_vm0, %v214_v4  ;;  %v9182_v4 = vld [vmem:[%s10841_s1 + $0x20] sm:$0xff] }
  0x1e   : > { %703 = vmatprep.mubr.f32.mxu1 %v9790_v0 }
  0x1f   : > { %546 = vrot.lane.b32.xlu0 %v9907_v8, %s9791_s20  ;;  %548 = vrot.lane.b32.xlu1 %v9918_v9, %s9791_s20  ;;  %s9811_s20 = smov 54  }
  0x23   : > { %862 = vrot.lane.b32.xlu0 %v9870_v1, %s9793_s23  ;;  %864 = vrot.lane.b32.xlu1 %v9886_v5, %s9793_s23 }
  0x27   : > { %860 = vrot.lane.b32.xlu0 %v9873_v2, %s9793_s23  ;;  %866 = vrot.lane.b32.xlu1 %v9880_v3, %s9793_s23 }
  0x2b   : > { %868 = vrot.lane.b32.xlu0 %v9902_v7, %s9793_s23  ;;  %870 = vrot.lane.b32.xlu1 %v9891_v6, %s9793_s23 }
  0x2f   : > { %872 = vrot.lane.b32.xlu0 %v9907_v8, %s9793_s23  ;;  %874 = vrot.lane.b32.xlu1 %v9918_v9, %s9793_s23  ;;  %s9812_s23 = smov 46  }
  0x33   : > { %1188 = vrot.lane.b32.xlu0 %v9870_v1, %s9794_s24  ;;  %1190 = vrot.lane.b32.xlu1 %v9886_v5, %s9794_s24 }
  0x37   : > { %1186 = vrot.lane.b32.xlu0 %v9873_v2, %s9794_s24  ;;  %1192 = vrot.lane.b32.xlu1 %v9880_v3, %s9794_s24 }
  0x3b   : > { %1194 = vrot.lane.b32.xlu0 %v9902_v7, %s9794_s24  ;;  %1196 = vrot.lane.b32.xlu1 %v9891_v6, %s9794_s24 }
  0x3f   : > { %1198 = vrot.lane.b32.xlu0 %v9907_v8, %s9794_s24  ;;  %1200 = vrot.lane.b32.xlu1 %v9918_v9, %s9794_s24 }
  0x43   : > { %1514 = vrot.lane.b32.xlu0 %v9870_v1, %s9795_s25  ;;  %1516 = vrot.lane.b32.xlu1 %v9886_v5, %s9795_s25 }
  0x47   : > { %1512 = vrot.lane.b32.xlu0 %v9873_v2, %s9795_s25  ;;  %1518 = vrot.lane.b32.xlu1 %v9880_v3, %s9795_s25 }
  0x4b   : > { %1520 = vrot.lane.b32.xlu0 %v9902_v7, %s9795_s25  ;;  %1522 = vrot.lane.b32.xlu1 %v9891_v6, %s9795_s25 }
  0x4f   : > { %1524 = vrot.lane.b32.xlu0 %v9907_v8, %s9795_s25  ;;  %1526 = vrot.lane.b32.xlu1 %v9918_v9, %s9795_s25  ;;  %s9805_s25 = smov 16  }
  0x53   : > { %1840 = vrot.lane.b32.xlu0 %v9870_v1, %s9796_s26  ;;  %1842 = vrot.lane.b32.xlu1 %v9886_v5, %s9796_s26 }
  0x57   : > { %1838 = vrot.lane.b32.xlu0 %v9873_v2, %s9796_s26  ;;  %1844 = vrot.lane.b32.xlu1 %v9880_v3, %s9796_s26 }
  0x5b   : > { %1846 = vrot.lane.b32.xlu0 %v9902_v7, %s9796_s26  ;;  %1848 = vrot.lane.b32.xlu1 %v9891_v6, %s9796_s26 }
  0x5f   : > { %1850 = vrot.lane.b32.xlu0 %v9907_v8, %s9796_s26  ;;  %1852 = vrot.lane.b32.xlu1 %v9918_v9, %s9796_s26  ;;  %s9813_s26 = smov 45  }
  0x63   : > { %2166 = vrot.lane.b32.xlu0 %v9870_v1, %s9797_s27  ;;  %2168 = vrot.lane.b32.xlu1 %v9886_v5, %s9797_s27 }
  0x67   : > { %2164 = vrot.lane.b32.xlu0 %v9873_v2, %s9797_s27  ;;  %2170 = vrot.lane.b32.xlu1 %v9880_v3, %s9797_s27 }
  0x6b   : > { %2172 = vrot.lane.b32.xlu0 %v9902_v7, %s9797_s27  ;;  %2174 = vrot.lane.b32.xlu1 %v9891_v6, %s9797_s27 }
  0x6f   : > { %2176 = vrot.lane.b32.xlu0 %v9907_v8, %s9797_s27  ;;  %2178 = vrot.lane.b32.xlu1 %v9918_v9, %s9797_s27 }
  0x73   : > { %2492 = vrot.lane.b32.xlu0 %v9870_v1, %s9798_s28  ;;  %2494 = vrot.lane.b32.xlu1 %v9886_v5, %s9798_s28 }
  0x77   : > { %2490 = vrot.lane.b32.xlu0 %v9873_v2, %s9798_s28  ;;  %2496 = vrot.lane.b32.xlu1 %v9880_v3, %s9798_s28 }
  0x7b   : > { %2498 = vrot.lane.b32.xlu0 %v9902_v7, %s9798_s28  ;;  %2500 = vrot.lane.b32.xlu1 %v9891_v6, %s9798_s28 }
  0x7f   : > { %2502 = vrot.lane.b32.xlu0 %v9907_v8, %s9798_s28  ;;  %2504 = vrot.lane.b32.xlu1 %v9918_v9, %s9798_s28  ;;  %s9806_s28 = smov 8  }
  0x83   : > { %2818 = vrot.lane.b32.xlu0 %v9870_v1, %s9799_s29  ;;  %2820 = vrot.lane.b32.xlu1 %v9886_v5, %s9799_s29 }
  0x85   : > { %v537_v10 = vpop.permute.xlu0 %536  ;;  %v535_v11 = vpop.permute.xlu1 %534 }
  0x86   : > { %v551_v16 = vsel %vm550_vm2, %v535_v11, %v537_v10 }
  0x87   : > { %2816 = vrot.lane.b32.xlu0 %v9873_v2, %s9799_s29  ;;  %2822 = vrot.lane.b32.xlu1 %v9880_v3, %s9799_s29 }
  0x89   : > { %v539_v12 = vpop.permute.xlu0 %538  ;;  %v541_v13 = vpop.permute.xlu1 %540 }
  0x8a   : > { %v552_v14 = vsel %vm550_vm2, %v537_v10, %v539_v12  ;;  %v553_v20 = vsel %vm550_vm2, %v539_v12, %v541_v13 }
  0x8b   : > { %2824 = vrot.lane.b32.xlu0 %v9902_v7, %s9799_s29  ;;  %2826 = vrot.lane.b32.xlu1 %v9891_v6, %s9799_s29 }
  0x8c   : > { %568 = vmatprep.subr.mxu0 %v552_v14 }
  0x8d   : > { %569 = vmatpush1.msra.mxu0 %v551_v16  ;;  %v543_v17 = vpop.permute.xlu0 %542  ;;  %v545_v18 = vpop.permute.xlu1 %544 }
  0x8e   : > { %v554_v19 = vsel %vm550_vm2, %v541_v13, %v543_v17  ;;  %9168 = vmatmul.mubr.msk.f32.vlgmr.msra.gmra.mrb[0].mxu0 %vm222_vm0, %v9167_v15  ;;  %v555_v25 = vsel %vm550_vm2, %v543_v17, %v545_v18 }
  0x8f   : > { %2828 = vrot.lane.b32.xlu0 %v9907_v8, %s9799_s29  ;;  %2830 = vrot.lane.b32.xlu1 %v9918_v9, %s9799_s29  ;;  %s9814_s29 = smov 44  }
  0x90   : > { %639 = vmatprep.subr.mxu1 %v554_v19  ;;  %774 = vmatprep.mubr.f32.mxu0 %v9790_v0 }
  0x91   : > { %640 = vmatpush1.msra.mxu1 %v553_v20  ;;  %v547_v21 = vpop.permute.xlu0 %546  ;;  %v549_v22 = vpop.permute.xlu1 %548 }
  0x92   : > { %v557_v23 = vsel %vm550_vm2, %v547_v21, %v549_v22  ;;  %9358 = vmatprep.subr.mxu1 %v9790_v0  ;;  %9169 = vmatmul.mubr.msk.f32.vlgmr.msra.gmra.mrb[0].mxu1 %vm222_vm0, %v9167_v15  ;;  %v556_v24 = vsel %vm550_vm2, %v545_v18, %v547_v21  ;;  %vm5439_vm2 = vcmask 56320  }
  0x93   : > { %3144 = vrot.lane.b32.xlu0 %v9870_v1, %s9800_s5  ;;  %3146 = vrot.lane.b32.xlu1 %v9886_v5, %s9800_s5 }
  0x94   : > { %710 = vmatprep.subr.mxu0 %v556_v24  ;;  %9359 = vmatpush3.msra.mxu1 %v557_v23 }
  0x95   : > { %711 = vmatpush1.msra.mxu0 %v555_v25  ;;  %v863_v26 = vpop.permute.xlu0 %862  ;;  %v865_v27 = vpop.permute.xlu1 %864  ;;  %9360 = vmatprep.mubr.msk.f32.mxu1 %vm9792_vm1, %v9790_v0  ;;  %v9187_v25 = vld [vmem:[%s10841_s1 + $0x28] sm:$0xff] }
  0x96   : > { %v878_v28 = vsel %vm876_vm3, %v863_v26, %v865_v27  ;;  %9170 = vmatmul.mubr.msk.f32.vlgmr.msra.gmra.mrb[2].mxu0 %vm222_vm0, %v9167_v15  ;;  %9361 = vmatmul.mubr.msk.f32.vlgmr.msra.gmra.mrb[2].mxu1 %vm222_vm0, %v9167_v15 }
  0x97   : > { %3142 = vrot.lane.b32.xlu0 %v9873_v2, %s9800_s5  ;;  %3148 = vrot.lane.b32.xlu1 %v9880_v3, %s9800_s5 }
  0x98   : > { %894 = vmatprep.subr.mxu0 %v878_v28  ;;  %1029 = vmatprep.mubr.f32.mxu1 %v9790_v0 }
  0x99   : > { %v861_v29 = vpop.permute.xlu0 %860  ;;  %v867_v30 = vpop.permute.xlu1 %866  ;;  %958 = vmatprep.mubr.f32.mxu0 %v9790_v0 }
  0x9a   : > { %v877_v31 = vsel %vm876_vm3, %v861_v29, %v863_v26  ;;  %v879_v36 = vsel %vm876_vm3, %v865_v27, %v867_v30 }
  0x9b   : > { %3150 = vrot.lane.b32.xlu0 %v9902_v7, %s9800_s5  ;;  %3152 = vrot.lane.b32.xlu1 %v9891_v6, %s9800_s5 }
  0x9c   : > { %895 = vmatpush1.msra.mxu0 %v877_v31 }
  0x9d   : > { %v869_v33 = vpop.permute.xlu0 %868  ;;  %v871_v34 = vpop.permute.xlu1 %870  ;;  %9173 = vmatmul.mubr.msk.f32.vlgmr.msra.gmra.mrb[0].mxu0 %vm222_vm0, %v9172_v32 }
  0x9e   : > { %v880_v35 = vsel %vm876_vm3, %v867_v30, %v869_v33  ;;  %1100 = vmatprep.mubr.f32.mxu0 %v9790_v0  ;;  %v881_v41 = vsel %vm876_vm3, %v869_v33, %v871_v34 }
  0x9f   : > { %3154 = vrot.lane.b32.xlu0 %v9907_v8, %s9800_s5  ;;  %3156 = vrot.lane.b32.xlu1 %v9918_v9, %s9800_s5  ;;  %s9815_s5 = smov 36  }
  0xa0   : > { %965 = vmatprep.subr.mxu1 %v880_v35 }
  0xa1   : > { %966 = vmatpush1.msra.mxu1 %v879_v36  ;;  %v873_v37 = vpop.permute.xlu0 %872  ;;  %v875_v38 = vpop.permute.xlu1 %874 }
  0xa2   : > { %v883_v39 = vsel %vm876_vm3, %v873_v37, %v875_v38  ;;  %9363 = vmatprep.subr.mxu1 %v9790_v0  ;;  %9174 = vmatmul.mubr.msk.f32.vlgmr.msra.gmra.mrb[0].mxu1 %vm222_vm0, %v9172_v32  ;;  %v882_v40 = vsel %vm876_vm3, %v871_v34, %v873_v37  ;;  %vm5765_vm3 = vcmask 48128  }
  0xa3   : > { %3470 = vrot.lane.b32.xlu0 %v9870_v1, %s9801_s8  ;;  %3472 = vrot.lane.b32.xlu1 %v9886_v5, %s9801_s8 }
  0xa4   : > { %1036 = vmatprep.subr.mxu0 %v882_v40  ;;  %9364 = vmatpush3.msra.mxu1 %v883_v39 }
  0xa5   : > { %1037 = vmatpush1.msra.mxu0 %v881_v41  ;;  %v1189_v42 = vpop.permute.xlu0 %1188  ;;  %v1191_v43 = vpop.permute.xlu1 %1190  ;;  %9365 = vmatprep.mubr.msk.f32.mxu1 %vm9792_vm1, %v9790_v0  ;;  %v9192_v41 = vld [vmem:[%s10841_s1 + $0x30] sm:$0xff] }
  0xa6   : > { %v1204_v44 = vsel %vm1202_vm4, %v1189_v42, %v1191_v43  ;;  %9175 = vmatmul.mubr.msk.f32.vlgmr.msra.gmra.mrb[2].mxu0 %vm222_vm0, %v9172_v32  ;;  %9366 = vmatmul.mubr.msk.f32.vlgmr.msra.gmra.mrb[2].mxu1 %vm222_vm0, %v9172_v32 }
  0xa7   : > { %3468 = vrot.lane.b32.xlu0 %v9873_v2, %s9801_s8  ;;  %3474 = vrot.lane.b32.xlu1 %v9880_v3, %s9801_s8 }
  0xa8   : > { %1220 = vmatprep.subr.mxu0 %v1204_v44  ;;  %1355 = vmatprep.mubr.f32.mxu1 %v9790_v0 }
  0xa9   : > { %v1187_v45 = vpop.permute.xlu0 %1186  ;;  %v1193_v46 = vpop.permute.xlu1 %1192  ;;  %1284 = vmatprep.mubr.f32.mxu0 %v9790_v0 }
  0xaa   : > { %v1203_v47 = vsel %vm1202_vm4, %v1187_v45, %v1189_v42  ;;  %v1205_v52 = vsel %vm1202_vm4, %v1191_v43, %v1193_v46 }
  0xab   : > { %3476 = vrot.lane.b32.xlu0 %v9902_v7, %s9801_s8  ;;  %3478 = vrot.lane.b32.xlu1 %v9891_v6, %s9801_s8 }
  0xac   : > { %1221 = vmatpush1.msra.mxu0 %v1203_v47 }
  0xad   : > { %v1195_v49 = vpop.permute.xlu0 %1194  ;;  %v1197_v50 = vpop.permute.xlu1 %1196  ;;  %9178 = vmatmul.mubr.msk.f32.vlgmr.msra.gmra.mrb[0].mxu0 %vm222_vm0, %v9177_v48 }
  0xae   : > { %v1206_v51 = vsel %vm1202_vm4, %v1193_v46, %v1195_v49  ;;  %1426 = vmatprep.mubr.f32.mxu0 %v9790_v0  ;;  %v1207_v57 = vsel %vm1202_vm4, %v1195_v49, %v1197_v50 }
  0xaf   : > { %3480 = vrot.lane.b32.xlu0 %v9907_v8, %s9801_s8  ;;  %3482 = vrot.lane.b32.xlu1 %v9918_v9, %s9801_s8  ;;  %s9816_s8 = smov 35  }
  0xb0   : > { %1291 = vmatprep.subr.mxu1 %v1206_v51 }
  0xb1   : > { %1292 = vmatpush1.msra.mxu1 %v1205_v52  ;;  %v1199_v53 = vpop.permute.xlu0 %1198  ;;  %v1201_v54 = vpop.permute.xlu1 %1200 }
  0xb2   : > { %v1209_v55 = vsel %vm1202_vm4, %v1199_v53, %v1201_v54  ;;  %9368 = vmatprep.subr.mxu1 %v9790_v0  ;;  %9179 = vmatmul.mubr.msk.f32.vlgmr.msra.gmra.mrb[0].mxu1 %vm222_vm0, %v9177_v48  ;;  %v1208_v56 = vsel %vm1202_vm4, %v1197_v50, %v1199_v53  ;;  %vm6107_vm4 = vcmask 457728  }
  0xb3   : > { %3796 = vrot.lane.b32.xlu0 %v9870_v1, %s9802_s11  ;;  %3798 = vrot.lane.b32.xlu1 %v9886_v5, %s9802_s11 }
  0xb4   : > { %1362 = vmatprep.subr.mxu0 %v1208_v56  ;;  %9369 = vmatpush3.msra.mxu1 %v1209_v55 }
  0xb5   : > { %1363 = vmatpush1.msra.mxu0 %v1207_v57  ;;  %v1515_v58 = vpop.permute.xlu0 %1514  ;;  %v1517_v59 = vpop.permute.xlu1 %1516  ;;  %9370 = vmatprep.mubr.msk.f32.mxu1 %vm9792_vm1, %v9790_v0  ;;  %v9197_v57 = vld [vmem:[%s10841_s1 + $0x38] sm:$0xff] }
  0xb6   : > { %v1530_v60 = vsel %vm1528_vm5, %v1515_v58, %v1517_v59  ;;  %9180 = vmatmul.mubr.msk.f32.vlgmr.msra.gmra.mrb[2].mxu0 %vm222_vm0, %v9177_v48  ;;  %9371 = vmatmul.mubr.msk.f32.vlgmr.msra.gmra.mrb[2].mxu1 %vm222_vm0, %v9177_v48 }
  0xb7   : > { %3794 = vrot.lane.b32.xlu0 %v9873_v2, %s9802_s11  ;;  %3800 = vrot.lane.b32.xlu1 %v9880_v3, %s9802_s11 }
  0xb8   : > { %1546 = vmatprep.subr.mxu0 %v1530_v60  ;;  %1681 = vmatprep.mubr.f32.mxu1 %v9790_v0 }
  0xb9   : > { %v1513_v61 = vpop.permute.xlu0 %1512  ;;  %v1519_v62 = vpop.permute.xlu1 %1518  ;;  %1610 = vmatprep.mubr.f32.mxu0 %v9790_v0 }
  0xba   : > { %v1529_v63 = vsel %vm1528_vm5, %v1513_v61, %v1515_v58  ;;  %v1531_v13 = vsel %vm1528_vm5, %v1517_v59, %v1519_v62 }
  0xbb   : > { %3802 = vrot.lane.b32.xlu0 %v9902_v7, %s9802_s11  ;;  %3804 = vrot.lane.b32.xlu1 %v9891_v6, %s9802_s11 }
  0xbc   : > { %1547 = vmatpush1.msra.mxu0 %v1529_v63 }
  0xbd   : > { %v1521_v10 = vpop.permute.xlu0 %1520  ;;  %v1523_v11 = vpop.permute.xlu1 %1522  ;;  %9183 = vmatmul.mubr.msk.f32.vlgmr.msra.gmra.mrb[0].mxu0 %vm222_vm0, %v9182_v4 }
  0xbe   : > { %v1532_v12 = vsel %vm1528_vm5, %v1519_v62, %v1521_v10  ;;  %1752 = vmatprep.mubr.f32.mxu0 %v9790_v0  ;;  %v1533_v18 = vsel %vm1528_vm5, %v1521_v10, %v1523_v11 }
  0xbf   : > { %3806 = vrot.lane.b32.xlu0 %v9907_v8, %s9802_s11  ;;  %3808 = vrot.lane.b32.xlu1 %v9918_v9, %s9802_s11  ;;  %s9817_s11 = smov 34  }
  0xc0   : > { %1617 = vmatprep.subr.mxu1 %v1532_v12 }
  0xc1   : > { %1618 = vmatpush1.msra.mxu1 %v1531_v13  ;;  %v1525_v14 = vpop.permute.xlu0 %1524  ;;  %v1527_v15 = vpop.permute.xlu1 %1526 }
  0xc2   : > { %v1535_v16 = vsel %vm1528_vm5, %v1525_v14, %v1527_v15  ;;  %9373 = vmatprep.subr.mxu1 %v9790_v0  ;;  %9184 = vmatmul.mubr.msk.f32.vlgmr.msra.gmra.mrb[0].mxu1 %vm222_vm0, %v9182_v4  ;;  %v1534_v17 = vsel %vm1528_vm5, %v1523_v11, %v1525_v14  ;;  %vm6433_vm5 = vcmask 449536  }
  0xc3   : > { %4122 = vrot.lane.b32.xlu0 %v9870_v1, %s9803_s18  ;;  %4124 = vrot.lane.b32.xlu1 %v9886_v5, %s9803_s18 }
  0xc4   : > { %1688 = vmatprep.subr.mxu0 %v1534_v17  ;;  %9374 = vmatpush3.msra.mxu1 %v1535_v16 }
  0xc5   : > { %1689 = vmatpush1.msra.mxu0 %v1533_v18  ;;  %v1841_v19 = vpop.permute.xlu0 %1840  ;;  %v1843_v20 = vpop.permute.xlu1 %1842  ;;  %9375 = vmatprep.mubr.msk.f32.mxu1 %vm9792_vm1, %v9790_v0  ;;  %v9202_v18 = vld [vmem:[%s10841_s1 + $0x40] sm:$0xff] }
  0xc6   : > { %v1856_v21 = vsel %vm1854_vm6, %v1841_v19, %v1843_v20  ;;  %9185 = vmatmul.mubr.msk.f32.vlgmr.msra.gmra.mrb[2].mxu0 %vm222_vm0, %v9182_v4  ;;  %9376 = vmatmul.mubr.msk.f32.vlgmr.msra.gmra.mrb[2].mxu1 %vm222_vm0, %v9182_v4 }
  0xc7   : > { %4120 = vrot.lane.b32.xlu0 %v9873_v2, %s9803_s18  ;;  %4126 = vrot.lane.b32.xlu1 %v9880_v3, %s9803_s18 }
  0xc8   : > { %1872 = vmatprep.subr.mxu0 %v1856_v21  ;;  %2007 = vmatprep.mubr.f32.mxu1 %v9790_v0 }
  0xc9   : > { %v1839_v22 = vpop.permute.xlu0 %1838  ;;  %v1845_v23 = vpop.permute.xlu1 %1844  ;;  %1936 = vmatprep.mubr.f32.mxu0 %v9790_v0 }
  0xca   : > { %v1855_v24 = vsel %vm1854_vm6, %v1839_v22, %v1841_v19  ;;  %v1857_v29 = vsel %vm1854_vm6, %v1843_v20, %v1845_v23 }
  0xcb   : > { %4128 = vrot.lane.b32.xlu0 %v9902_v7, %s9803_s18  ;;  %4130 = vrot.lane.b32.xlu1 %v9891_v6, %s9803_s18 }
  0xcc   : > { %1873 = vmatpush1.msra.mxu0 %v1855_v24 }
  0xcd   : > { %v1847_v26 = vpop.permute.xlu0 %1846  ;;  %v1849_v27 = vpop.permute.xlu1 %1848  ;;  %9188 = vmatmul.mubr.msk.f32.vlgmr.msra.gmra.mrb[0].mxu0 %vm222_vm0, %v9187_v25 }
  0xce   : > { %v1858_v28 = vsel %vm1854_vm6, %v1845_v23, %v1847_v26  ;;  %2078 = vmatprep.mubr.f32.mxu0 %v9790_v0  ;;  %v1859_v34 = vsel %vm1854_vm6, %v1847_v26, %v1849_v27 }
  0xcf   : > { %4132 = vrot.lane.b32.xlu0 %v9907_v8, %s9803_s18  ;;  %4134 = vrot.lane.b32.xlu1 %v9918_v9, %s9803_s18 }
  0xd0   : > { %1943 = vmatprep.subr.mxu1 %v1858_v28 }
  0xd1   : > { %1944 = vmatpush1.msra.mxu1 %v1857_v29  ;;  %v1851_v30 = vpop.permute.xlu0 %1850  ;;  %v1853_v31 = vpop.permute.xlu1 %1852 }
  0xd2   : > { %v1861_v32 = vsel %vm1854_vm6, %v1851_v30, %v1853_v31  ;;  %9378 = vmatprep.subr.mxu1 %v9790_v0  ;;  %9189 = vmatmul.mubr.msk.f32.vlgmr.msra.gmra.mrb[0].mxu1 %vm222_vm0, %v9187_v25  ;;  %v1860_v33 = vsel %vm1854_vm6, %v1849_v27, %v1851_v30  ;;  %vm6759_vm6 = vcmask 441344  }
  0xd3   : > { %4448 = vrot.lane.b32.xlu0 %v9870_v1, %s9804_s22  ;;  %4450 = vrot.lane.b32.xlu1 %v9886_v5, %s9804_s22 }
  0xd4   : > { %2014 = vmatprep.subr.mxu0 %v1860_v33  ;;  %9379 = vmatpush3.msra.mxu1 %v1861_v32 }
  0xd5   : > { %2015 = vmatpush1.msra.mxu0 %v1859_v34  ;;  %v2167_v35 = vpop.permute.xlu0 %2166  ;;  %v2169_v36 = vpop.permute.xlu1 %2168  ;;  %9380 = vmatprep.mubr.msk.f32.mxu1 %vm9792_vm1, %v9790_v0  ;;  %v9207_v34 = vld [vmem:[%s10841_s1 + $0x48] sm:$0xff] }
  0xd6   : > { %v2182_v37 = vsel %vm2180_vm7, %v2167_v35, %v2169_v36  ;;  %9190 = vmatmul.mubr.msk.f32.vlgmr.msra.gmra.mrb[2].mxu0 %vm222_vm0, %v9187_v25  ;;  %9381 = vmatmul.mubr.msk.f32.vlgmr.msra.gmra.mrb[2].mxu1 %vm222_vm0, %v9187_v25 }
  0xd7   : > { %4446 = vrot.lane.b32.xlu0 %v9873_v2, %s9804_s22  ;;  %4452 = vrot.lane.b32.xlu1 %v9880_v3, %s9804_s22 }
  0xd8   : > { %2198 = vmatprep.subr.mxu0 %v2182_v37  ;;  %2333 = vmatprep.mubr.f32.mxu1 %v9790_v0 }
  0xd9   : > { %v2165_v38 = vpop.permute.xlu0 %2164  ;;  %v2171_v39 = vpop.permute.xlu1 %2170  ;;  %2262 = vmatprep.mubr.f32.mxu0 %v9790_v0 }
  0xda   : > { %v2181_v40 = vsel %vm2180_vm7, %v2165_v38, %v2167_v35  ;;  %v2183_v45 = vsel %vm2180_vm7, %v2169_v36, %v2171_v39 }
  0xdb   : > { %4454 = vrot.lane.b32.xlu0 %v9902_v7, %s9804_s22  ;;  %4456 = vrot.lane.b32.xlu1 %v9891_v6, %s9804_s22 }
  0xdc   : > { %2199 = vmatpush1.msra.mxu0 %v2181_v40 }
  0xdd   : > { %v2173_v42 = vpop.permute.xlu0 %2172  ;;  %v2175_v43 = vpop.permute.xlu1 %2174  ;;  %9193 = vmatmul.mubr.msk.f32.vlgmr.msra.gmra.mrb[0].mxu0 %vm222_vm0, %v9192_v41 }
  0xde   : > { %v2184_v44 = vsel %vm2180_vm7, %v2171_v39, %v2173_v42  ;;  %2404 = vmatprep.mubr.f32.mxu0 %v9790_v0  ;;  %v2185_v50 = vsel %vm2180_vm7, %v2173_v42, %v2175_v43 }
  0xdf   : > { %4458 = vrot.lane.b32.xlu0 %v9907_v8, %s9804_s22  ;;  %4460 = vrot.lane.b32.xlu1 %v9918_v9, %s9804_s22 }
  0xe0   : > { %2269 = vmatprep.subr.mxu1 %v2184_v44 }
  0xe1   : > { %2270 = vmatpush1.msra.mxu1 %v2183_v45  ;;  %v2177_v46 = vpop.permute.xlu0 %2176  ;;  %v2179_v47 = vpop.permute.xlu1 %2178 }
  0xe2   : > { %v2187_v48 = vsel %vm2180_vm7, %v2177_v46, %v2179_v47  ;;  %9383 = vmatprep.subr.mxu1 %v9790_v0  ;;  %9194 = vmatmul.mubr.msk.f32.vlgmr.msra.gmra.mrb[0].mxu1 %vm222_vm0, %v9192_v41  ;;  %v2186_v49 = vsel %vm2180_vm7, %v2175_v43, %v2177_v46  ;;  %vm7085_vm7 = vcmask 375808  }
  0xe3   : > { %4774 = vrot.lane.b32.xlu0 %v9870_v1, %s9805_s25  ;;  %4776 = vrot.lane.b32.xlu1 %v9886_v5, %s9805_s25 }
  0xe4   : > { %2340 = vmatprep.subr.mxu0 %v2186_v49  ;;  %9384 = vmatpush3.msra.mxu1 %v2187_v48  ;;  %v9212_v49 = vld [vmem:[%s10841_s1 + $0x50] sm:$0xff] }
  0xe5   : > { %2341 = vmatpush1.msra.mxu0 %v2185_v50  ;;  %v2493_v51 = vpop.permute.xlu0 %2492  ;;  %v2495_v52 = vpop.permute.xlu1 %2494  ;;  %9385 = vmatprep.mubr.msk.f32.mxu1 %vm9792_vm1, %v9790_v0 }
  0xe6   : > { %v2508_v53 = vsel %vm2506_vm8, %v2493_v51, %v2495_v52  ;;  %9195 = vmatmul.mubr.msk.f32.vlgmr.msra.gmra.mrb[2].mxu0 %vm222_vm0, %v9192_v41  ;;  %9386 = vmatmul.mubr.msk.f32.vlgmr.msra.gmra.mrb[2].mxu1 %vm222_vm0, %v9192_v41 }
  0xe7   : > { %4772 = vrot.lane.b32.xlu0 %v9873_v2, %s9805_s25  ;;  %4778 = vrot.lane.b32.xlu1 %v9880_v3, %s9805_s25 }
  0xe8   : > { %2524 = vmatprep.subr.mxu0 %v2508_v53  ;;  %2659 = vmatprep.mubr.f32.mxu1 %v9790_v0 }
  0xe9   : > { %v2491_v54 = vpop.permute.xlu0 %2490  ;;  %v2497_v55 = vpop.permute.xlu1 %2496  ;;  %2588 = vmatprep.mubr.f32.mxu0 %v9790_v0 }
  0xea   : > { %v2507_v56 = vsel %vm2506_vm8, %v2491_v54, %v2493_v51  ;;  %v2509_v61 = vsel %vm2506_vm8, %v2495_v52, %v2497_v55 }
  0xeb   : > { %4780 = vrot.lane.b32.xlu0 %v9902_v7, %s9805_s25  ;;  %4782 = vrot.lane.b32.xlu1 %v9891_v6, %s9805_s25 }
  0xec   : > { %2525 = vmatpush1.msra.mxu0 %v2507_v56 }
  0xed   : > { %v2499_v58 = vpop.permute.xlu0 %2498  ;;  %v2501_v59 = vpop.permute.xlu1 %2500  ;;  %9198 = vmatmul.mubr.msk.f32.vlgmr.msra.gmra.mrb[0].mxu0 %vm222_vm0, %v9197_v57 }
  0xee   : > { %v2510_v60 = vsel %vm2506_vm8, %v2497_v55, %v2499_v58  ;;  %2730 = vmatprep.mubr.f32.mxu0 %v9790_v0  ;;  %v2511_v11 = vsel %vm2506_vm8, %v2499_v58, %v2501_v59  ;;  %v10331_v55 = vld [vmem:[%s9867_s19 + $0x20] sm:$0xff]  ;;  %v10346_v58 = vld [vmem:[%s9867_s19 + $0x30] sm:$0xff] }
  0xef   : > { %4784 = vrot.lane.b32.xlu0 %v9907_v8, %s9805_s25  ;;  %4786 = vrot.lane.b32.xlu1 %v9918_v9, %s9805_s25 }
  0xf0   : > { %2595 = vmatprep.subr.mxu1 %v2510_v60 }
  0xf1   : > { %2596 = vmatpush1.msra.mxu1 %v2509_v61  ;;  %v2503_v62 = vpop.permute.xlu0 %2502  ;;  %v2505_v63 = vpop.permute.xlu1 %2504 }
  0xf2   : > { %v2513_v4 = vsel %vm2506_vm8, %v2503_v62, %v2505_v63  ;;  %9388 = vmatprep.subr.mxu1 %v9790_v0  ;;  %9199 = vmatmul.mubr.msk.f32.vlgmr.msra.gmra.mrb[0].mxu1 %vm222_vm0, %v9197_v57  ;;  %v2512_v10 = vsel %vm2506_vm8, %v2501_v59, %v2503_v62  ;;  %v9217_v62 = vld [vmem:[%s10841_s1 + $0x58] sm:$0xff]  ;;  %vm7411_vm8 = vcmask 367616  }
  0xf3   : > { %5100 = vrot.lane.b32.xlu0 %v9870_v1, %s9806_s28  ;;  %5102 = vrot.lane.b32.xlu1 %v9886_v5, %s9806_s28  ;;  %v10359_v63 = vld [vmem:[%s9867_s19 + $0x38] sm:$0xff] }
  0xf4   : > { %2666 = vmatprep.subr.mxu0 %v2512_v10  ;;  %9389 = vmatpush3.msra.mxu1 %v2513_v4  ;;  %v10362_v4 = vld [vmem:[%s9867_s19 + $0x40] sm:$0xff] }
  0xf5   : > { %2667 = vmatpush1.msra.mxu0 %v2511_v11  ;;  %v2819_v12 = vpop.permute.xlu0 %2818  ;;  %v2821_v13 = vpop.permute.xlu1 %2820  ;;  %9390 = vmatprep.mubr.msk.f32.mxu1 %vm9792_vm1, %v9790_v0 }
  0xf6   : > { %v2834_v14 = vsel %vm2832_vm9, %v2819_v12, %v2821_v13  ;;  %9200 = vmatmul.mubr.msk.f32.vlgmr.msra.gmra.mrb[2].mxu0 %vm222_vm0, %v9197_v57  ;;  %9391 = vmatmul.mubr.msk.f32.vlgmr.msra.gmra.mrb[2].mxu1 %vm222_vm0, %v9197_v57 }
  0xf7   : > { %5098 = vrot.lane.b32.xlu0 %v9873_v2, %s9806_s28  ;;  %5104 = vrot.lane.b32.xlu1 %v9880_v3, %s9806_s28 }
  0xf8   : > { %2850 = vmatprep.subr.mxu0 %v2834_v14  ;;  %2985 = vmatprep.mubr.f32.mxu1 %v9790_v0 }
  0xf9   : > { %v2817_v15 = vpop.permute.xlu0 %2816  ;;  %v2823_v16 = vpop.permute.xlu1 %2822  ;;  %2914 = vmatprep.mubr.f32.mxu0 %v9790_v0 }
  0xfa   : > { %v2833_v17 = vsel %vm2832_vm9, %v2817_v15, %v2819_v12  ;;  %v2835_v22 = vsel %vm2832_vm9, %v2821_v13, %v2823_v16 }
  0xfb   : > { %5106 = vrot.lane.b32.xlu0 %v9902_v7, %s9806_s28  ;;  %5108 = vrot.lane.b32.xlu1 %v9891_v6, %s9806_s28 }
  0xfc   : > { %2851 = vmatpush1.msra.mxu0 %v2833_v17 }
  0xfd   : > { %v2825_v19 = vpop.permute.xlu0 %2824  ;;  %v2827_v20 = vpop.permute.xlu1 %2826  ;;  %9203 = vmatmul.mubr.msk.f32.vlgmr.msra.gmra.mrb[0].mxu0 %vm222_vm0, %v9202_v18 }
  0xfe   : > { %v2836_v21 = vsel %vm2832_vm9, %v2823_v16, %v2825_v19  ;;  %3056 = vmatprep.mubr.f32.mxu0 %v9790_v0  ;;  %v2837_v27 = vsel %vm2832_vm9, %v2825_v19, %v2827_v20  ;;  %v10382_v19 = vld [vmem:[%s9867_s19 + $0x18] sm:$0xff] }
  0xff   : > { %5110 = vrot.lane.b32.xlu0 %v9907_v8, %s9806_s28  ;;  %5112 = vrot.lane.b32.xlu1 %v9918_v9, %s9806_s28 }
 0x100   : > { %2921 = vmatprep.subr.mxu1 %v2836_v21 }
 0x101   : > { %2922 = vmatpush1.msra.mxu1 %v2835_v22  ;;  %v2829_v23 = vpop.permute.xlu0 %2828  ;;  %v2831_v24 = vpop.permute.xlu1 %2830 }
 0x102   : > { %v2839_v25 = vsel %vm2832_vm9, %v2829_v23, %v2831_v24  ;;  %9393 = vmatprep.subr.mxu1 %v9790_v0  ;;  %9204 = vmatmul.mubr.msk.f32.vlgmr.msra.gmra.mrb[0].mxu1 %vm222_vm0, %v9202_v18  ;;  %v2838_v26 = vsel %vm2832_vm9, %v2827_v20, %v2829_v23  ;;  %vm7737_vm9 = vcmask 359424  }
 0x103   : > { %5425 = vrot.lane.b32.xlu0 %v9870_v1, %s9807_s4  ;;  %5427 = vrot.lane.b32.xlu1 %v9886_v5, %s9807_s4 }
 0x104   : > { %2992 = vmatprep.subr.mxu0 %v2838_v26  ;;  %9394 = vmatpush3.msra.mxu1 %v2839_v25 }
 0x105   : > { %2993 = vmatpush1.msra.mxu0 %v2837_v27  ;;  %v3145_v28 = vpop.permute.xlu0 %3144  ;;  %v3147_v29 = vpop.permute.xlu1 %3146  ;;  %9395 = vmatprep.mubr.msk.f32.mxu1 %vm9792_vm1, %v9790_v0  ;;  %v9222_v27 = vld [vmem:[%s10841_s1 + $0x60] sm:$0xff] }
 0x106   : > { %v3160_v30 = vsel %vm3158_vm10, %v3145_v28, %v3147_v29  ;;  %9205 = vmatmul.mubr.msk.f32.vlgmr.msra.gmra.mrb[2].mxu0 %vm222_vm0, %v9202_v18  ;;  %9396 = vmatmul.mubr.msk.f32.vlgmr.msra.gmra.mrb[2].mxu1 %vm222_vm0, %v9202_v18  ;;  %v10377_v18 = vld [vmem:[%s9867_s19 + $0x10] sm:$0xff] }
 0x107   : > { %5423 = vrot.lane.b32.xlu0 %v9873_v2, %s9807_s4  ;;  %5429 = vrot.lane.b32.xlu1 %v9880_v3, %s9807_s4 }
 0x108   : > { %3176 = vmatprep.subr.mxu0 %v3160_v30  ;;  %3311 = vmatprep.mubr.f32.mxu1 %v9790_v0 }
 0x109   : > { %v3143_v31 = vpop.permute.xlu0 %3142  ;;  %v3149_v32 = vpop.permute.xlu1 %3148  ;;  %3240 = vmatprep.mubr.f32.mxu0 %v9790_v0 }
 0x10a   : > { %v3159_v33 = vsel %vm3158_vm10, %v3143_v31, %v3145_v28  ;;  %v3161_v38 = vsel %vm3158_vm10, %v3147_v29, %v3149_v32 }
 0x10b   : > { %5431 = vrot.lane.b32.xlu0 %v9902_v7, %s9807_s4  ;;  %5433 = vrot.lane.b32.xlu1 %v9891_v6, %s9807_s4 }
 0x10c   : > { %3177 = vmatpush1.msra.mxu0 %v3159_v33 }
 0x10d   : > { %v3151_v35 = vpop.permute.xlu0 %3150  ;;  %v3153_v36 = vpop.permute.xlu1 %3152  ;;  %9208 = vmatmul.mubr.msk.f32.vlgmr.msra.gmra.mrb[0].mxu0 %vm222_vm0, %v9207_v34 }
 0x10e   : > { %v3162_v37 = vsel %vm3158_vm10, %v3149_v32, %v3151_v35  ;;  %3382 = vmatprep.mubr.f32.mxu0 %v9790_v0  ;;  %v3163_v43 = vsel %vm3158_vm10, %v3151_v35, %v3153_v36 }
 0x10f   : > { %5435 = vrot.lane.b32.xlu0 %v9907_v8, %s9807_s4  ;;  %5437 = vrot.lane.b32.xlu1 %v9918_v9, %s9807_s4 }
 0x110   : > { %3247 = vmatprep.subr.mxu1 %v3162_v37 }
 0x111   : > { %3248 = vmatpush1.msra.mxu1 %v3161_v38  ;;  %v3155_v39 = vpop.permute.xlu0 %3154  ;;  %v3157_v40 = vpop.permute.xlu1 %3156 }
 0x112   : > { %v3165_v41 = vsel %vm3158_vm10, %v3155_v39, %v3157_v40  ;;  %9398 = vmatprep.subr.mxu1 %v9790_v0  ;;  %9209 = vmatmul.mubr.msk.f32.vlgmr.msra.gmra.mrb[0].mxu1 %vm222_vm0, %v9207_v34  ;;  %v3164_v42 = vsel %vm3158_vm10, %v3153_v36, %v3155_v39  ;;  %vm8063_vm10 = vcmask 293888  }
 0x113   : > { %5751 = vrot.lane.b32.xlu0 %v9870_v1, %s9808_s7  ;;  %5753 = vrot.lane.b32.xlu1 %v9886_v5, %s9808_s7 }
 0x114   : > { %3318 = vmatprep.subr.mxu0 %v3164_v42  ;;  %9399 = vmatpush3.msra.mxu1 %v3165_v41 }
 0x115   : > { %3319 = vmatpush1.msra.mxu0 %v3163_v43  ;;  %v3471_v44 = vpop.permute.xlu0 %3470  ;;  %v3473_v45 = vpop.permute.xlu1 %3472  ;;  %9400 = vmatprep.mubr.msk.f32.mxu1 %vm9792_vm1, %v9790_v0  ;;  %v9227_v43 = vld [vmem:[%s10841_s1 + $0x68] sm:$0xff] }
 0x116   : > { %v3486_v46 = vsel %vm3484_vm11, %v3471_v44, %v3473_v45  ;;  %9210 = vmatmul.mubr.msk.f32.vlgmr.msra.gmra.mrb[2].mxu0 %vm222_vm0, %v9207_v34  ;;  %9401 = vmatmul.mubr.msk.f32.vlgmr.msra.gmra.mrb[2].mxu1 %vm222_vm0, %v9207_v34 }
 0x117   : > { %5749 = vrot.lane.b32.xlu0 %v9873_v2, %s9808_s7  ;;  %5755 = vrot.lane.b32.xlu1 %v9880_v3, %s9808_s7 }
 0x118   : > { %3502 = vmatprep.subr.mxu0 %v3486_v46  ;;  %3637 = vmatprep.mubr.f32.mxu1 %v9790_v0 }
 0x119   : > { %v3469_v1 = vpop.permute.xlu0 %3468  ;;  %v3475_v47 = vpop.permute.xlu1 %3474  ;;  %3566 = vmatprep.mubr.f32.mxu0 %v9790_v0 }
 0x11a   : > { %v3485_v48 = vsel %vm3484_vm11, %v3469_v1, %v3471_v44 }
 0x11b   : > { %5757 = vrot.lane.b32.xlu0 %v9902_v7, %s9808_s7  ;;  %5759 = vrot.lane.b32.xlu1 %v9891_v6, %s9808_s7  ;;  %v3487_v7 = vsel %vm3484_vm11, %v3473_v45, %v3475_v47 }
 0x11c   : > { %3503 = vmatpush1.msra.mxu0 %v3485_v48 }
 0x11d   : > { %v3477_v2 = vpop.permute.xlu0 %3476  ;;  %v3479_v50 = vpop.permute.xlu1 %3478  ;;  %9213 = vmatmul.mubr.msk.f32.vlgmr.msra.gmra.mrb[0].mxu0 %vm222_vm0, %v9212_v49 }
 0x11e   : > { %v3488_v51 = vsel %vm3484_vm11, %v3475_v47, %v3477_v2  ;;  %3708 = vmatprep.mubr.f32.mxu0 %v9790_v0 }
 0x11f   : > { %5761 = vrot.lane.b32.xlu0 %v9907_v8, %s9808_s7  ;;  %5763 = vrot.lane.b32.xlu1 %v9918_v9, %s9808_s7  ;;  %v3489_v8 = vsel %vm3484_vm11, %v3477_v2, %v3479_v50  ;;  %v10328_v9 = vld [vmem:[%s9867_s19 + $0x8] sm:$0xff]  ;;  %s9704_s7 = smul.u32 56, %s10849_s12 }
 0x120   : > { %3573 = vmatprep.subr.mxu1 %v3488_v51 }
 0x121   : > { %3574 = vmatpush1.msra.mxu1 %v3487_v7  ;;  %v3481_v6 = vpop.permute.xlu0 %3480  ;;  %v3483_v52 = vpop.permute.xlu1 %3482 }
 0x122   : > { %v3491_v53 = vsel %vm3484_vm11, %v3481_v6, %v3483_v52  ;;  %9403 = vmatprep.subr.mxu1 %v9790_v0  ;;  %9214 = vmatmul.mubr.msk.f32.vlgmr.msra.gmra.mrb[0].mxu1 %vm222_vm0, %v9212_v49  ;;  %v3490_v54 = vsel %vm3484_vm11, %v3479_v50, %v3481_v6  ;;  %vm8389_vm11 = vcmask 285696  }
 0x123   : > { %6093 = vrot.lane.b32.xlu0 %v9886_v5, %s9809_s10  ;;  %6095 = vrot.lane.b32.xlu1 %v9880_v3, %s9809_s10  ;;  %v10343_v3 = vld [vmem:[%s9867_s19 + $0x28] sm:$0xff] }
 0x124   : > { %3644 = vmatprep.subr.mxu0 %v3490_v54  ;;  %9404 = vmatpush3.msra.mxu1 %v3491_v53 }
 0x125   : > { %3645 = vmatpush1.msra.mxu0 %v3489_v8  ;;  %v3797_v56 = vpop.permute.xlu0 %3796  ;;  %v3799_v57 = vpop.permute.xlu1 %3798  ;;  %9405 = vmatprep.mubr.msk.f32.mxu1 %vm9792_vm1, %v9790_v0  ;;  %v9232_v8 = vld [vmem:[%s10841_s1 + $0x70] sm:$0xff] }
 0x126   : > { %v3812_v5 = vsel %vm3810_vm12, %v3797_v56, %v3799_v57  ;;  %9215 = vmatmul.mubr.msk.f32.vlgmr.msra.gmra.mrb[2].mxu0 %vm222_vm0, %v9212_v49  ;;  %9406 = vmatmul.mubr.msk.f32.vlgmr.msra.gmra.mrb[2].mxu1 %vm222_vm0, %v9212_v49 }
 0x127   : > { %6091 = vrot.lane.b32.xlu0 %v10328_v9, %s9809_s10  ;;  %6097 = vrot.lane.b32.xlu1 %v10331_v55, %s9809_s10 }
 0x128   : > { %3828 = vmatprep.subr.mxu0 %v3812_v5  ;;  %3963 = vmatprep.mubr.f32.mxu1 %v9790_v0 }
 0x129   : > { %v3795_v59 = vpop.permute.xlu0 %3794  ;;  %v3801_v60 = vpop.permute.xlu1 %3800  ;;  %3892 = vmatprep.mubr.f32.mxu0 %v9790_v0 }
 0x12a   : > { %v3811_v61 = vsel %vm3810_vm12, %v3795_v59, %v3797_v56  ;;  %v3813_v13 = vsel %vm3810_vm12, %v3799_v57, %v3801_v60 }
 0x12b   : > { %6099 = vrot.lane.b32.xlu0 %v10343_v3, %s9809_s10  ;;  %6101 = vrot.lane.b32.xlu1 %v10346_v58, %s9809_s10 }
 0x12c   : > { %3829 = vmatpush1.msra.mxu0 %v3811_v61 }
 0x12d   : > { %v3803_v10 = vpop.permute.xlu0 %3802  ;;  %v3805_v11 = vpop.permute.xlu1 %3804  ;;  %9218 = vmatmul.mubr.msk.f32.vlgmr.msra.gmra.mrb[0].mxu0 %vm222_vm0, %v9217_v62 }
 0x12e   : > { %v3814_v12 = vsel %vm3810_vm12, %v3801_v60, %v3803_v10  ;;  %4034 = vmatprep.mubr.f32.mxu0 %v9790_v0  ;;  %v3815_v20 = vsel %vm3810_vm12, %v3803_v10, %v3805_v11 }
 0x12f   : > { %6103 = vrot.lane.b32.xlu0 %v10359_v63, %s9809_s10  ;;  %6105 = vrot.lane.b32.xlu1 %v10362_v4, %s9809_s10  ;;  %s10822_s10 = scalar_lea.vmem %s10843_s3, %s9704_s7 }
 0x130   : > { %3899 = vmatprep.subr.mxu1 %v3814_v12 }
 0x131   : > { %3900 = vmatpush1.msra.mxu1 %v3813_v13  ;;  %v3807_v14 = vpop.permute.xlu0 %3806  ;;  %v3809_v15 = vpop.permute.xlu1 %3808 }
 0x132   : > { %v3817_v16 = vsel %vm3810_vm12, %v3807_v14, %v3809_v15  ;;  %9408 = vmatprep.subr.mxu1 %v9790_v0  ;;  %9219 = vmatmul.mubr.msk.f32.vlgmr.msra.gmra.mrb[0].mxu1 %vm222_vm0, %v9217_v62  ;;  %v3816_v17 = vsel %vm3810_vm12, %v3805_v11, %v3807_v14  ;;  %vm8715_vm12 = vcmask 277504  }
 0x133   : > { %6419 = vrot.lane.b32.xlu0 %v10377_v18, %s9810_s17  ;;  %6421 = vrot.lane.b32.xlu1 %v10382_v19, %s9810_s17 }
 0x134   : > { %3970 = vmatprep.subr.mxu0 %v3816_v17  ;;  %9409 = vmatpush3.msra.mxu1 %v3817_v16 }
 0x135   : > { %3971 = vmatpush1.msra.mxu0 %v3815_v20  ;;  %v4123_v21 = vpop.permute.xlu0 %4122  ;;  %v4125_v22 = vpop.permute.xlu1 %4124  ;;  %9410 = vmatprep.mubr.msk.f32.mxu1 %vm9792_vm1, %v9790_v0  ;;  %v9237_v20 = vld [vmem:[%s10841_s1 + $0x78] sm:$0xff] }
 0x136   : > { %v4138_v23 = vsel %vm4136_vm13, %v4123_v21, %v4125_v22  ;;  %9220 = vmatmul.mubr.msk.f32.vlgmr.msra.gmra.mrb[2].mxu0 %vm222_vm0, %v9217_v62  ;;  %9411 = vmatmul.mubr.msk.f32.vlgmr.msra.gmra.mrb[2].mxu1 %vm222_vm0, %v9217_v62 }
 0x137   : > { %6417 = vrot.lane.b32.xlu0 %v10328_v9, %s9810_s17  ;;  %6423 = vrot.lane.b32.xlu1 %v10331_v55, %s9810_s17 }
 0x138   : > { %4154 = vmatprep.subr.mxu0 %v4138_v23  ;;  %4289 = vmatprep.mubr.f32.mxu1 %v9790_v0 }
 0x139   : > { %v4121_v24 = vpop.permute.xlu0 %4120  ;;  %v4127_v25 = vpop.permute.xlu1 %4126  ;;  %4218 = vmatprep.mubr.f32.mxu0 %v9790_v0 }
 0x13a   : > { %v4137_v26 = vsel %vm4136_vm13, %v4121_v24, %v4123_v21  ;;  %v4139_v31 = vsel %vm4136_vm13, %v4125_v22, %v4127_v25 }
 0x13b   : > { %6425 = vrot.lane.b32.xlu0 %v10343_v3, %s9810_s17  ;;  %6427 = vrot.lane.b32.xlu1 %v10346_v58, %s9810_s17 }
 0x13c   : > { %4155 = vmatpush1.msra.mxu0 %v4137_v26 }
 0x13d   : > { %v4129_v28 = vpop.permute.xlu0 %4128  ;;  %v4131_v29 = vpop.permute.xlu1 %4130  ;;  %9223 = vmatmul.mubr.msk.f32.vlgmr.msra.gmra.mrb[0].mxu0 %vm222_vm0, %v9222_v27 }
 0x13e   : > { %v4140_v30 = vsel %vm4136_vm13, %v4127_v25, %v4129_v28  ;;  %4360 = vmatprep.mubr.f32.mxu0 %v9790_v0  ;;  %v4141_v36 = vsel %vm4136_vm13, %v4129_v28, %v4131_v29 }
 0x13f   : > { %6429 = vrot.lane.b32.xlu0 %v10359_v63, %s9810_s17  ;;  %6431 = vrot.lane.b32.xlu1 %v10362_v4, %s9810_s17 }
 0x140   : > { %4225 = vmatprep.subr.mxu1 %v4140_v30 }
 0x141   : > { %4226 = vmatpush1.msra.mxu1 %v4139_v31  ;;  %v4133_v32 = vpop.permute.xlu0 %4132  ;;  %v4135_v33 = vpop.permute.xlu1 %4134 }
 0x142   : > { %v4143_v34 = vsel %vm4136_vm13, %v4133_v32, %v4135_v33  ;;  %9413 = vmatprep.subr.mxu1 %v9790_v0  ;;  %9224 = vmatmul.mubr.msk.f32.vlgmr.msra.gmra.mrb[0].mxu1 %vm222_vm0, %v9222_v27  ;;  %v4142_v35 = vsel %vm4136_vm13, %v4131_v29, %v4133_v32 }
 0x143   : > { %6745 = vrot.lane.b32.xlu0 %v10377_v18, %s9811_s20  ;;  %6747 = vrot.lane.b32.xlu1 %v10382_v19, %s9811_s20 }
 0x144   : > { %4296 = vmatprep.subr.mxu0 %v4142_v35  ;;  %9414 = vmatpush3.msra.mxu1 %v4143_v34 }
 0x145   : > { %4297 = vmatpush1.msra.mxu0 %v4141_v36  ;;  %v4449_v37 = vpop.permute.xlu0 %4448  ;;  %v4451_v38 = vpop.permute.xlu1 %4450  ;;  %9415 = vmatprep.mubr.msk.f32.mxu1 %vm9792_vm1, %v9790_v0  ;;  %v9242_v36 = vld [vmem:[%s10841_s1 + $0x80] sm:$0xff] }
 0x146   : > { %v4464_v39 = vsel %vm4462_vm14, %v4449_v37, %v4451_v38  ;;  %9225 = vmatmul.mubr.msk.f32.vlgmr.msra.gmra.mrb[2].mxu0 %vm222_vm0, %v9222_v27  ;;  %9416 = vmatmul.mubr.msk.f32.vlgmr.msra.gmra.mrb[2].mxu1 %vm222_vm0, %v9222_v27 }
 0x147   : > { %6743 = vrot.lane.b32.xlu0 %v10328_v9, %s9811_s20  ;;  %6749 = vrot.lane.b32.xlu1 %v10331_v55, %s9811_s20 }
 0x148   : > { %4480 = vmatprep.subr.mxu0 %v4464_v39  ;;  %4615 = vmatprep.mubr.f32.mxu1 %v9790_v0 }
 0x149   : > { %v4447_v40 = vpop.permute.xlu0 %4446  ;;  %v4453_v41 = vpop.permute.xlu1 %4452  ;;  %4544 = vmatprep.mubr.f32.mxu0 %v9790_v0 }
 0x14a   : > { %v4463_v42 = vsel %vm4462_vm14, %v4447_v40, %v4449_v37  ;;  %v4465_v1 = vsel %vm4462_vm14, %v4451_v38, %v4453_v41 }
 0x14b   : > { %6751 = vrot.lane.b32.xlu0 %v10343_v3, %s9811_s20  ;;  %6753 = vrot.lane.b32.xlu1 %v10346_v58, %s9811_s20 }
 0x14c   : > { %4481 = vmatpush1.msra.mxu0 %v4463_v42 }
 0x14d   : > { %v4455_v44 = vpop.permute.xlu0 %4454  ;;  %v4457_v45 = vpop.permute.xlu1 %4456  ;;  %9228 = vmatmul.mubr.msk.f32.vlgmr.msra.gmra.mrb[0].mxu0 %vm222_vm0, %v9227_v43 }
 0x14e   : > { %v4466_v46 = vsel %vm4462_vm14, %v4453_v41, %v4455_v44  ;;  %4686 = vmatprep.mubr.f32.mxu0 %v9790_v0  ;;  %v4467_v50 = vsel %vm4462_vm14, %v4455_v44, %v4457_v45 }
 0x14f   : > { %6755 = vrot.lane.b32.xlu0 %v10359_v63, %s9811_s20  ;;  %6757 = vrot.lane.b32.xlu1 %v10362_v4, %s9811_s20 }
 0x150   : > { %4551 = vmatprep.subr.mxu1 %v4466_v46 }
 0x151   : > { %4552 = vmatpush1.msra.mxu1 %v4465_v1  ;;  %v4459_v47 = vpop.permute.xlu0 %4458  ;;  %v4461_v48 = vpop.permute.xlu1 %4460 }
 0x152   : > { %v4469_v49 = vsel %vm4462_vm14, %v4459_v47, %v4461_v48  ;;  %9418 = vmatprep.subr.mxu1 %v9790_v0  ;;  %9229 = vmatmul.mubr.msk.f32.vlgmr.msra.gmra.mrb[0].mxu1 %vm222_vm0, %v9227_v43  ;;  %v4468_v2 = vsel %vm4462_vm14, %v4457_v45, %v4459_v47 }
 0x153   : > { %7071 = vrot.lane.b32.xlu0 %v10377_v18, %s9812_s23  ;;  %7073 = vrot.lane.b32.xlu1 %v10382_v19, %s9812_s23 }
 0x154   : > { %4622 = vmatprep.subr.mxu0 %v4468_v2  ;;  %9419 = vmatpush3.msra.mxu1 %v4469_v49 }
 0x155   : > { %4623 = vmatpush1.msra.mxu0 %v4467_v50  ;;  %v4775_v51 = vpop.permute.xlu0 %4774  ;;  %v4777_v7 = vpop.permute.xlu1 %4776  ;;  %9420 = vmatprep.mubr.msk.f32.mxu1 %vm9792_vm1, %v9790_v0  ;;  %v9247_v50 = vld [vmem:[%s10841_s1 + $0x88] sm:$0xff] }
 0x156   : > { %v4790_v6 = vsel %vm4788_vm15, %v4775_v51, %v4777_v7  ;;  %9230 = vmatmul.mubr.msk.f32.vlgmr.msra.gmra.mrb[2].mxu0 %vm222_vm0, %v9227_v43  ;;  %9421 = vmatmul.mubr.msk.f32.vlgmr.msra.gmra.mrb[2].mxu1 %vm222_vm0, %v9227_v43 }
 0x157   : > { %7069 = vrot.lane.b32.xlu0 %v10328_v9, %s9812_s23  ;;  %7075 = vrot.lane.b32.xlu1 %v10331_v55, %s9812_s23 }
 0x158   : > { %4806 = vmatprep.subr.mxu0 %v4790_v6  ;;  %4941 = vmatprep.mubr.f32.mxu1 %v9790_v0 }
 0x159   : > { %v4773_v52 = vpop.permute.xlu0 %4772  ;;  %v4779_v53 = vpop.permute.xlu1 %4778  ;;  %4870 = vmatprep.mubr.f32.mxu0 %v9790_v0 }
 0x15a   : > { %v4789_v54 = vsel %vm4788_vm15, %v4773_v52, %v4775_v51  ;;  %v4791_v59 = vsel %vm4788_vm15, %v4777_v7, %v4779_v53 }
 0x15b   : > { %7077 = vrot.lane.b32.xlu0 %v10343_v3, %s9812_s23  ;;  %7079 = vrot.lane.b32.xlu1 %v10346_v58, %s9812_s23 }
 0x15c   : > { %4807 = vmatpush1.msra.mxu0 %v4789_v54 }
 0x15d   : > { %v4781_v56 = vpop.permute.xlu0 %4780  ;;  %v4783_v57 = vpop.permute.xlu1 %4782  ;;  %9233 = vmatmul.mubr.msk.f32.vlgmr.msra.gmra.mrb[0].mxu0 %vm222_vm0, %v9232_v8 }
 0x15e   : > { %v4792_v5 = vsel %vm4788_vm15, %v4779_v53, %v4781_v56  ;;  %5012 = vmatprep.mubr.f32.mxu0 %v9790_v0  ;;  %v4793_v11 = vsel %vm4788_vm15, %v4781_v56, %v4783_v57 }
 0x15f   : > { %7081 = vrot.lane.b32.xlu0 %v10359_v63, %s9812_s23  ;;  %7083 = vrot.lane.b32.xlu1 %v10362_v4, %s9812_s23 }
 0x160   : > { %4877 = vmatprep.subr.mxu1 %v4792_v5 }
 0x161   : > { %4878 = vmatpush1.msra.mxu1 %v4791_v59  ;;  %v4785_v60 = vpop.permute.xlu0 %4784  ;;  %v4787_v61 = vpop.permute.xlu1 %4786 }
 0x162   : > { %v4795_v62 = vsel %vm4788_vm15, %v4785_v60, %v4787_v61  ;;  %9423 = vmatprep.subr.mxu1 %v9790_v0  ;;  %9234 = vmatmul.mubr.msk.f32.vlgmr.msra.gmra.mrb[0].mxu1 %vm222_vm0, %v9232_v8  ;;  %v4794_v10 = vsel %vm4788_vm15, %v4783_v57, %v4785_v60 }
 0x163   : > { %7397 = vrot.lane.b32.xlu0 %v10377_v18, %s9813_s26  ;;  %7399 = vrot.lane.b32.xlu1 %v10382_v19, %s9813_s26 }
 0x164   : > { %4948 = vmatprep.subr.mxu0 %v4794_v10  ;;  %9424 = vmatpush3.msra.mxu1 %v4795_v62 }
 0x165   : > { %4949 = vmatpush1.msra.mxu0 %v4793_v11  ;;  %v5101_v12 = vpop.permute.xlu0 %5100  ;;  %v5103_v13 = vpop.permute.xlu1 %5102  ;;  %9425 = vmatprep.mubr.msk.f32.mxu1 %vm9792_vm1, %v9790_v0  ;;  %v9252_v11 = vld [vmem:[%s10841_s1 + $0x90] sm:$0xff] }
 0x166   : > { %v5115_v14 = vsel %vm222_vm0, %v5101_v12, %v5103_v13  ;;  %9235 = vmatmul.mubr.msk.f32.vlgmr.msra.gmra.mrb[2].mxu0 %vm222_vm0, %v9232_v8  ;;  %9426 = vmatmul.mubr.msk.f32.vlgmr.msra.gmra.mrb[2].mxu1 %vm222_vm0, %v9232_v8 }
 0x167   : > { %7395 = vrot.lane.b32.xlu0 %v10328_v9, %s9813_s26  ;;  %7401 = vrot.lane.b32.xlu1 %v10331_v55, %s9813_s26 }
 0x168   : > { %5131 = vmatprep.subr.mxu0 %v5115_v14  ;;  %5266 = vmatprep.mubr.f32.mxu1 %v9790_v0 }
 0x169   : > { %v5099_v15 = vpop.permute.xlu0 %5098  ;;  %v5105_v16 = vpop.permute.xlu1 %5104  ;;  %5195 = vmatprep.mubr.f32.mxu0 %v9790_v0 }
 0x16a   : > { %v5114_v17 = vsel %vm222_vm0, %v5099_v15, %v5101_v12  ;;  %v5116_v24 = vsel %vm222_vm0, %v5103_v13, %v5105_v16 }
 0x16b   : > { %7403 = vrot.lane.b32.xlu0 %v10343_v3, %s9813_s26  ;;  %7405 = vrot.lane.b32.xlu1 %v10346_v58, %s9813_s26 }
 0x16c   : > { %5132 = vmatpush1.msra.mxu0 %v5114_v17 }
 0x16d   : > { %v5107_v21 = vpop.permute.xlu0 %5106  ;;  %v5109_v22 = vpop.permute.xlu1 %5108  ;;  %9238 = vmatmul.mubr.msk.f32.vlgmr.msra.gmra.mrb[0].mxu0 %vm222_vm0, %v9237_v20 }
 0x16e   : > { %v5117_v23 = vsel %vm222_vm0, %v5105_v16, %v5107_v21  ;;  %5337 = vmatprep.mubr.f32.mxu0 %v9790_v0  ;;  %v5118_v29 = vsel %vm222_vm0, %v5107_v21, %v5109_v22 }
 0x16f   : > { %7407 = vrot.lane.b32.xlu0 %v10359_v63, %s9813_s26  ;;  %7409 = vrot.lane.b32.xlu1 %v10362_v4, %s9813_s26 }
 0x170   : > { %5202 = vmatprep.subr.mxu1 %v5117_v23 }
 0x171   : > { %5203 = vmatpush1.msra.mxu1 %v5116_v24  ;;  %v5111_v25 = vpop.permute.xlu0 %5110  ;;  %v5113_v26 = vpop.permute.xlu1 %5112 }
 0x172   : > { %v5120_v27 = vsel %vm222_vm0, %v5111_v25, %v5113_v26  ;;  %9428 = vmatprep.subr.mxu1 %v9790_v0  ;;  %9239 = vmatmul.mubr.msk.f32.vlgmr.msra.gmra.mrb[0].mxu1 %vm222_vm0, %v9237_v20  ;;  %v5119_v28 = vsel %vm222_vm0, %v5109_v22, %v5111_v25  ;;  %v9818_v26 = vmov 2  }
 0x173   : > { %7723 = vrot.lane.b32.xlu0 %v10377_v18, %s9814_s29  ;;  %7725 = vrot.lane.b32.xlu1 %v10382_v19, %s9814_s29 }
 0x174   : > { %5273 = vmatprep.subr.mxu0 %v5119_v28  ;;  %9429 = vmatpush3.msra.mxu1 %v5120_v27  ;;  %v9257_v28 = vld [vmem:[%s10841_s1 + $0x98] sm:$0xff] }
 0x175   : > { %5274 = vmatpush1.msra.mxu0 %v5118_v29  ;;  %v5426_v30 = vpop.permute.xlu0 %5425  ;;  %v5428_v31 = vpop.permute.xlu1 %5427  ;;  %9430 = vmatprep.mubr.msk.f32.mxu1 %vm9792_vm1, %v9790_v0  ;;  %v9819_v29 = vmov 0  }
 0x176   : > { %v5441_v32 = vsel %vm5439_vm2, %v5426_v30, %v5428_v31  ;;  %9240 = vmatmul.mubr.msk.f32.vlgmr.msra.gmra.mrb[2].mxu0 %vm222_vm0, %v9237_v20  ;;  %9431 = vmatmul.mubr.msk.f32.vlgmr.msra.gmra.mrb[2].mxu1 %vm222_vm0, %v9237_v20 }
 0x177   : > { %7721 = vrot.lane.b32.xlu0 %v10328_v9, %s9814_s29  ;;  %7727 = vrot.lane.b32.xlu1 %v10331_v55, %s9814_s29 }
 0x178   : > { %5457 = vmatprep.subr.mxu0 %v5441_v32  ;;  %5592 = vmatprep.mubr.f32.mxu1 %v9790_v0 }
 0x179   : > { %v5424_v33 = vpop.permute.xlu0 %5423  ;;  %v5430_v34 = vpop.permute.xlu1 %5429  ;;  %5521 = vmatprep.mubr.f32.mxu0 %v9790_v0  ;;  %9761 = vset.pattern.permute.xlu1 %v9818_v26 }
 0x17a   : > { %v5440_v35 = vsel %vm5439_vm2, %v5424_v33, %v5426_v30  ;;  %v5442_v40 = vsel %vm5439_vm2, %v5428_v31, %v5430_v34  ;;  %9760 = vset.pattern.permute.xlu0 %v9819_v29 }
 0x17b   : > { %7729 = vrot.lane.b32.xlu0 %v10343_v3, %s9814_s29  ;;  %7731 = vrot.lane.b32.xlu1 %v10346_v58, %s9814_s29 }
 0x17c   : > { %5458 = vmatpush1.msra.mxu0 %v5440_v35 }
 0x17d   : > { %v5432_v37 = vpop.permute.xlu0 %5431  ;;  %v5434_v38 = vpop.permute.xlu1 %5433  ;;  %9243 = vmatmul.mubr.msk.f32.vlgmr.msra.gmra.mrb[0].mxu0 %vm222_vm0, %v9242_v36 }
 0x17e   : > { %v5443_v39 = vsel %vm5439_vm2, %v5430_v34, %v5432_v37  ;;  %5663 = vmatprep.mubr.f32.mxu0 %v9790_v0  ;;  %v5444_v45 = vsel %vm5439_vm2, %v5432_v37, %v5434_v38 }
 0x17f   : > { %7733 = vrot.lane.b32.xlu0 %v10359_v63, %s9814_s29  ;;  %7735 = vrot.lane.b32.xlu1 %v10362_v4, %s9814_s29 }
 0x180   : > { %5528 = vmatprep.subr.mxu1 %v5443_v39  ;;  %v9262_v39 = vld [vmem:[%s10841_s1 + $0xa0] sm:$0xff] }
 0x181   : > { %5529 = vmatpush1.msra.mxu1 %v5442_v40  ;;  %v5436_v41 = vpop.permute.xlu0 %5435  ;;  %v5438_v42 = vpop.permute.xlu1 %5437  ;;  %v9820_v40 = vmov 1  }
 0x182   : > { %v5446_v43 = vsel %vm5439_vm2, %v5436_v41, %v5438_v42  ;;  %9433 = vmatprep.subr.mxu1 %v9790_v0  ;;  %9244 = vmatmul.mubr.msk.f32.vlgmr.msra.gmra.mrb[0].mxu1 %vm222_vm0, %v9242_v36  ;;  %v5445_v44 = vsel %vm5439_vm2, %v5434_v38, %v5436_v41 }
 0x183   : > { %8049 = vrot.lane.b32.xlu0 %v10377_v18, %s9815_s5  ;;  %8051 = vrot.lane.b32.xlu1 %v10382_v19, %s9815_s5 }
 0x184   : > { %5599 = vmatprep.subr.mxu0 %v5445_v44  ;;  %9434 = vmatpush3.msra.mxu1 %v5446_v43 }
 0x185   : > { %5600 = vmatpush1.msra.mxu0 %v5444_v45  ;;  %v5752_v46 = vpop.permute.xlu0 %5751  ;;  %v5754_v1 = vpop.permute.xlu1 %5753  ;;  %9435 = vmatprep.mubr.msk.f32.mxu1 %vm9792_vm1, %v9790_v0 }
 0x186   : > { %v5767_v47 = vsel %vm5765_vm3, %v5752_v46, %v5754_v1  ;;  %9245 = vmatmul.mubr.msk.f32.vlgmr.msra.gmra.mrb[2].mxu0 %vm222_vm0, %v9242_v36  ;;  %9436 = vmatmul.mubr.msk.f32.vlgmr.msra.gmra.mrb[2].mxu1 %vm222_vm0, %v9242_v36 }
 0x187   : > { %8047 = vrot.lane.b32.xlu0 %v10328_v9, %s9815_s5  ;;  %8053 = vrot.lane.b32.xlu1 %v10331_v55, %s9815_s5 }
 0x188   : > { %5783 = vmatprep.subr.mxu0 %v5767_v47  ;;  %5918 = vmatprep.mubr.f32.mxu1 %v9790_v0 }
 0x189   : > { %v5750_v48 = vpop.permute.xlu0 %5749  ;;  %v5756_v49 = vpop.permute.xlu1 %5755  ;;  %5847 = vmatprep.mubr.f32.mxu0 %v9790_v0 }
 0x18a   : > { %v5766_v2 = vsel %vm5765_vm3, %v5750_v48, %v5752_v46  ;;  %v5768_v52 = vsel %vm5765_vm3, %v5754_v1, %v5756_v49 }
 0x18b   : > { %8055 = vrot.lane.b32.xlu0 %v10343_v3, %s9815_s5  ;;  %8057 = vrot.lane.b32.xlu1 %v10346_v58, %s9815_s5 }
 0x18c   : > { %5784 = vmatpush1.msra.mxu0 %v5766_v2 }
 0x18d   : > { %v5758_v51 = vpop.permute.xlu0 %5757  ;;  %v5760_v7 = vpop.permute.xlu1 %5759  ;;  %9248 = vmatmul.mubr.msk.f32.vlgmr.msra.gmra.mrb[0].mxu0 %vm222_vm0, %v9247_v50 }
 0x18e   : > { %v5769_v6 = vsel %vm5765_vm3, %v5756_v49, %v5758_v51  ;;  %5989 = vmatprep.mubr.f32.mxu0 %v9790_v0  ;;  %v5770_v57 = vsel %vm5765_vm3, %v5758_v51, %v5760_v7 }
 0x18f   : > { %8059 = vrot.lane.b32.xlu0 %v10359_v63, %s9815_s5  ;;  %8061 = vrot.lane.b32.xlu1 %v10362_v4, %s9815_s5 }
 0x190   : > { %5854 = vmatprep.subr.mxu1 %v5769_v6 }
 0x191   : > { %5855 = vmatpush1.msra.mxu1 %v5768_v52  ;;  %v5762_v53 = vpop.permute.xlu0 %5761  ;;  %v5764_v54 = vpop.permute.xlu1 %5763  ;;  %v9267_v52 = vld [vmem:[%s10841_s1 + $0xa8] sm:$0xff] }
 0x192   : > { %v5772_v8 = vsel %vm5765_vm3, %v5762_v53, %v5764_v54  ;;  %9438 = vmatprep.subr.mxu1 %v9790_v0  ;;  %9249 = vmatmul.mubr.msk.f32.vlgmr.msra.gmra.mrb[0].mxu1 %vm222_vm0, %v9247_v50  ;;  %v5771_v56 = vsel %vm5765_vm3, %v5760_v7, %v5762_v53 }
 0x193   : > { %8375 = vrot.lane.b32.xlu0 %v10377_v18, %s9816_s8  ;;  %8377 = vrot.lane.b32.xlu1 %v10382_v19, %s9816_s8 }
 0x194   : > { %5925 = vmatprep.subr.mxu0 %v5771_v56  ;;  %9439 = vmatpush3.msra.mxu1 %v5772_v8 }
 0x195   : > { %5926 = vmatpush1.msra.mxu0 %v5770_v57  ;;  %v6094_v5 = vpop.permute.xlu0 %6093  ;;  %v6096_v59 = vpop.permute.xlu1 %6095  ;;  %9440 = vmatprep.mubr.msk.f32.mxu1 %vm9792_vm1, %v9790_v0 }
 0x196   : > { %v6109_v60 = vsel %vm6107_vm4, %v6094_v5, %v6096_v59  ;;  %9250 = vmatmul.mubr.msk.f32.vlgmr.msra.gmra.mrb[2].mxu0 %vm222_vm0, %v9247_v50  ;;  %9441 = vmatmul.mubr.msk.f32.vlgmr.msra.gmra.mrb[2].mxu1 %vm222_vm0, %v9247_v50 }
 0x197   : > { %8373 = vrot.lane.b32.xlu0 %v10328_v9, %s9816_s8  ;;  %8379 = vrot.lane.b32.xlu1 %v10331_v55, %s9816_s8 }
 0x198   : > { %6125 = vmatprep.subr.mxu0 %v6109_v60  ;;  %6260 = vmatprep.mubr.f32.mxu1 %v9790_v0 }
 0x199   : > { %v6092_v61 = vpop.permute.xlu0 %6091  ;;  %v6098_v62 = vpop.permute.xlu1 %6097  ;;  %6189 = vmatprep.mubr.f32.mxu0 %v9790_v0 }
 0x19a   : > { %v6108_v10 = vsel %vm6107_vm4, %v6092_v61, %v6094_v5  ;;  %v6110_v15 = vsel %vm6107_vm4, %v6096_v59, %v6098_v62 }
 0x19b   : > { %8381 = vrot.lane.b32.xlu0 %v10343_v3, %s9816_s8  ;;  %8383 = vrot.lane.b32.xlu1 %v10346_v58, %s9816_s8 }
 0x19c   : > { %6126 = vmatpush1.msra.mxu0 %v6108_v10 }
 0x19d   : > { %v6100_v12 = vpop.permute.xlu0 %6099  ;;  %v6102_v13 = vpop.permute.xlu1 %6101  ;;  %9253 = vmatmul.mubr.msk.f32.vlgmr.msra.gmra.mrb[0].mxu0 %vm222_vm0, %v9252_v11 }
 0x19e   : > { %v6111_v14 = vsel %vm6107_vm4, %v6098_v62, %v6100_v12  ;;  %6331 = vmatprep.mubr.f32.mxu0 %v9790_v0  ;;  %v6112_v22 = vsel %vm6107_vm4, %v6100_v12, %v6102_v13 }
 0x19f   : > { %8385 = vrot.lane.b32.xlu0 %v10359_v63, %s9816_s8  ;;  %8387 = vrot.lane.b32.xlu1 %v10362_v4, %s9816_s8 }
 0x1a0   : > { %6196 = vmatprep.subr.mxu1 %v6111_v14 }
 0x1a1   : > { %6197 = vmatpush1.msra.mxu1 %v6110_v15  ;;  %v6104_v16 = vpop.permute.xlu0 %6103  ;;  %v6106_v17 = vpop.permute.xlu1 %6105  ;;  %v9272_v15 = vld [vmem:[%s10841_s1 + $0xb0] sm:$0xff] }
 0x1a2   : > { %v6114_v20 = vsel %vm6107_vm4, %v6104_v16, %v6106_v17  ;;  %9443 = vmatprep.subr.mxu1 %v9790_v0  ;;  %9254 = vmatmul.mubr.msk.f32.vlgmr.msra.gmra.mrb[0].mxu1 %vm222_vm0, %v9252_v11  ;;  %v6113_v21 = vsel %vm6107_vm4, %v6102_v13, %v6104_v16 }
 0x1a3   : > { %8701 = vrot.lane.b32.xlu0 %v10377_v18, %s9817_s11  ;;  %8703 = vrot.lane.b32.xlu1 %v10382_v19, %s9817_s11 }
 0x1a4   : > { %6267 = vmatprep.subr.mxu0 %v6113_v21  ;;  %9444 = vmatpush3.msra.mxu1 %v6114_v20 }
 0x1a5   : > { %6268 = vmatpush1.msra.mxu0 %v6112_v22  ;;  %v6420_v23 = vpop.permute.xlu0 %6419  ;;  %v6422_v24 = vpop.permute.xlu1 %6421  ;;  %9445 = vmatprep.mubr.msk.f32.mxu1 %vm9792_vm1, %v9790_v0 }
 0x1a6   : > { %v6435_v25 = vsel %vm6433_vm5, %v6420_v23, %v6422_v24  ;;  %9255 = vmatmul.mubr.msk.f32.vlgmr.msra.gmra.mrb[2].mxu0 %vm222_vm0, %v9252_v11  ;;  %9446 = vmatmul.mubr.msk.f32.vlgmr.msra.gmra.mrb[2].mxu1 %vm222_vm0, %v9252_v11 }
 0x1a7   : > { %8699 = vrot.lane.b32.xlu0 %v10328_v9, %s9817_s11  ;;  %8705 = vrot.lane.b32.xlu1 %v10331_v55, %s9817_s11 }
 0x1a8   : > { %6451 = vmatprep.subr.mxu0 %v6435_v25  ;;  %6586 = vmatprep.mubr.f32.mxu1 %v9790_v0 }
 0x1a9   : > { %v6418_v18 = vpop.permute.xlu0 %6417  ;;  %v6424_v19 = vpop.permute.xlu1 %6423  ;;  %6515 = vmatprep.mubr.f32.mxu0 %v9790_v0 }
 0x1aa   : > { %v6434_v27 = vsel %vm6433_vm5, %v6418_v18, %v6420_v23 }
 0x1ab   : > { %8707 = vrot.lane.b32.xlu0 %v10343_v3, %s9817_s11  ;;  %8709 = vrot.lane.b32.xlu1 %v10346_v58, %s9817_s11  ;;  %v6436_v3 = vsel %vm6433_vm5, %v6422_v24, %v6424_v19 }
 0x1ac   : > { %6452 = vmatpush1.msra.mxu0 %v6434_v27 }
 0x1ad   : > { %v6426_v9 = vpop.permute.xlu0 %6425  ;;  %v6428_v55 = vpop.permute.xlu1 %6427  ;;  %9258 = vmatmul.mubr.msk.f32.vlgmr.msra.gmra.mrb[0].mxu0 %vm222_vm0, %v9257_v28 }
 0x1ae   : > { %v6437_v30 = vsel %vm6433_vm5, %v6424_v19, %v6426_v9  ;;  %6657 = vmatprep.mubr.f32.mxu0 %v9790_v0 }
 0x1af   : > { %8711 = vrot.lane.b32.xlu0 %v10359_v63, %s9817_s11  ;;  %8713 = vrot.lane.b32.xlu1 %v10362_v4, %s9817_s11  ;;  %v208_v63 = vld [vmem:[%s10842_s2] sm:$0xff]  ;;  %v6438_v4 = vsel %vm6433_vm5, %v6426_v9, %v6428_v55 }
 0x1b0   : > { %6522 = vmatprep.subr.mxu1 %v6437_v30 }
 0x1b1   : > { %6523 = vmatpush1.msra.mxu1 %v6436_v3  ;;  %v6430_v58 = vpop.permute.xlu0 %6429  ;;  %v6432_v31 = vpop.permute.xlu1 %6431 }
 0x1b2   : > { %v6440_v32 = vsel %vm6433_vm5, %v6430_v58, %v6432_v31  ;;  %9448 = vmatprep.subr.mxu1 %v9790_v0  ;;  %9259 = vmatmul.mubr.msk.f32.vlgmr.msra.gmra.mrb[0].mxu1 %vm222_vm0, %v9257_v28  ;;  %v6439_v33 = vsel %vm6433_vm5, %v6428_v55, %v6430_v58  ;;  %v9277_v55 = vld [vmem:[%s10841_s1 + $0xb8] sm:$0xff] }
 0x1b3   : > { %6593 = vmatprep.subr.mxu0 %v6439_v33  ;;  %9449 = vmatpush3.msra.mxu1 %v6440_v32 }
 0x1b4   : > { %6594 = vmatpush1.msra.mxu0 %v6438_v4  ;;  %9450 = vmatprep.mubr.msk.f32.mxu1 %vm9792_vm1, %v9790_v0 }
 0x1b5   : > { %v6746_v34 = vpop.permute.xlu0 %6745  ;;  %v6748_v35 = vpop.permute.xlu1 %6747  ;;  %9260 = vmatmul.mubr.msk.f32.vlgmr.msra.gmra.mrb[2].mxu0 %vm222_vm0, %v9257_v28  ;;  %9031 = vperm.xlu1 %9761, %v208_v63  }
 0x1b6   : > { %v6761_v36 = vsel %vm6759_vm6, %v6746_v34, %v6748_v35  ;;  %9451 = vmatmul.mubr.msk.f32.vlgmr.msra.gmra.mrb[2].mxu1 %vm222_vm0, %v9257_v28  ;;  %6841 = vmatprep.mubr.f32.mxu0 %v9790_v0 }
 0x1b7   : > { %6777 = vmatprep.subr.mxu0 %v6761_v36  ;;  %6912 = vmatprep.mubr.f32.mxu1 %v9790_v0 }
 0x1b8   : > { %211 = vperm.xlu0 %9760, %v208_v63  }
 0x1b9   : > { %v6744_v37 = vpop.permute.xlu0 %6743  ;;  %v6750_v38 = vpop.permute.xlu1 %6749  ;;  %9762 = vset.pattern.permute.xlu1 %v9820_v40 }
 0x1ba   : > { %v6760_v41 = vsel %vm6759_vm6, %v6744_v37, %v6746_v34  ;;  %9042 = vperm.xlu1 %9762, %v208_v63   ;;  %v6762_v45 = vsel %vm6759_vm6, %v6748_v35, %v6750_v38 }
 0x1bb   : > { %6778 = vmatpush1.msra.mxu0 %v6760_v41  ;;  %v9282_v41 = vld [vmem:[%s10841_s1 + $0xc0] sm:$0xff] }
 0x1bc   : > { %9263 = vmatmul.mubr.msk.f32.vlgmr.msra.gmra.mrb[0].mxu0 %vm222_vm0, %v9262_v39  ;;  %9763 = vset.pattern.permute.xlu0 %v9820_v40 }
 0x1bd   : > { %v6752_v42 = vpop.permute.xlu0 %6751  ;;  %v6754_v43 = vpop.permute.xlu1 %6753  ;;  %6983 = vmatprep.mubr.f32.mxu0 %v9790_v0 }
 0x1be   : > { %v6763_v44 = vsel %vm6759_vm6, %v6750_v38, %v6752_v42  ;;  %v6764_v49 = vsel %vm6759_vm6, %v6752_v42, %v6754_v43 }
 0x1bf   : > { %6848 = vmatprep.subr.mxu1 %v6763_v44 }
 0x1c0   : > { %6849 = vmatpush1.msra.mxu1 %v6762_v45 }
 0x1c1   : > { %v6756_v46 = vpop.permute.xlu0 %6755  ;;  %v6758_v1 = vpop.permute.xlu1 %6757  ;;  %9453 = vmatprep.subr.mxu1 %v9790_v0  ;;  %9264 = vmatmul.mubr.msk.f32.vlgmr.msra.gmra.mrb[0].mxu1 %vm222_vm0, %v9262_v39 }
 0x1c2   : > { %v6766_v47 = vsel %vm6759_vm6, %v6756_v46, %v6758_v1  ;;  %v6765_v48 = vsel %vm6759_vm6, %v6754_v43, %v6756_v46  ;;  %9455 = vmatprep.mubr.msk.f32.mxu1 %vm9792_vm1, %v9790_v0 }
 0x1c3   : > { %6919 = vmatprep.subr.mxu0 %v6765_v48  ;;  %9454 = vmatpush3.msra.mxu1 %v6766_v47 }
 0x1c4   : > { %6920 = vmatpush1.msra.mxu0 %v6764_v49 }
 0x1c5   : > { %v7072_v2 = vpop.permute.xlu0 %7071  ;;  %v7074_v50 = vpop.permute.xlu1 %7073  ;;  %9265 = vmatmul.mubr.msk.f32.vlgmr.msra.gmra.mrb[2].mxu0 %vm222_vm0, %v9262_v39  ;;  %9456 = vmatmul.mubr.msk.f32.vlgmr.msra.gmra.mrb[2].mxu1 %vm222_vm0, %v9262_v39 }
 0x1c6   : > { %v7087_v51 = vsel %vm7085_vm7, %v7072_v2, %v7074_v50  ;;  %7238 = vmatprep.mubr.f32.mxu1 %v9790_v0  ;;  %7167 = vmatprep.mubr.f32.mxu0 %v9790_v0 }
 0x1c7   : > { %7103 = vmatprep.subr.mxu0 %v7087_v51 }
 0x1c9   : > { %v7070_v7 = vpop.permute.xlu0 %7069  ;;  %v7076_v6 = vpop.permute.xlu1 %7075 }
 0x1ca   : > { %v7086_v53 = vsel %vm7085_vm7, %v7070_v7, %v7072_v2  ;;  %v7088_v57 = vsel %vm7085_vm7, %v7074_v50, %v7076_v6 }
 0x1cb   : > { %7104 = vmatpush1.msra.mxu0 %v7086_v53  ;;  %v9287_v53 = vld [vmem:[%s10841_s1 + $0xc8] sm:$0xff] }
 0x1cc   : > { %9268 = vmatmul.mubr.msk.f32.vlgmr.msra.gmra.mrb[0].mxu0 %vm222_vm0, %v9267_v52 }
 0x1cd   : > { %v7078_v54 = vpop.permute.xlu0 %7077  ;;  %v7080_v8 = vpop.permute.xlu1 %7079  ;;  %7309 = vmatprep.mubr.f32.mxu0 %v9790_v0 }
 0x1ce   : > { %v7089_v56 = vsel %vm7085_vm7, %v7076_v6, %v7078_v54  ;;  %v7090_v62 = vsel %vm7085_vm7, %v7078_v54, %v7080_v8 }
 0x1cf   : > { %7174 = vmatprep.subr.mxu1 %v7089_v56 }
 0x1d0   : > { %7175 = vmatpush1.msra.mxu1 %v7088_v57 }
 0x1d1   : > { %v7082_v5 = vpop.permute.xlu0 %7081  ;;  %v7084_v59 = vpop.permute.xlu1 %7083  ;;  %9458 = vmatprep.subr.mxu1 %v9790_v0  ;;  %9269 = vmatmul.mubr.msk.f32.vlgmr.msra.gmra.mrb[0].mxu1 %vm222_vm0, %v9267_v52 }
 0x1d2   : > { %v7092_v60 = vsel %vm7085_vm7, %v7082_v5, %v7084_v59  ;;  %v7091_v61 = vsel %vm7085_vm7, %v7080_v8, %v7082_v5  ;;  %9460 = vmatprep.mubr.msk.f32.mxu1 %vm9792_vm1, %v9790_v0 }
 0x1d3   : > { %7245 = vmatprep.subr.mxu0 %v7091_v61  ;;  %9459 = vmatpush3.msra.mxu1 %v7092_v60 }
 0x1d4   : > { %7246 = vmatpush1.msra.mxu0 %v7090_v62 }
 0x1d5   : > { %v7398_v10 = vpop.permute.xlu0 %7397  ;;  %v7400_v11 = vpop.permute.xlu1 %7399  ;;  %9270 = vmatmul.mubr.msk.f32.vlgmr.msra.gmra.mrb[2].mxu0 %vm222_vm0, %v9267_v52  ;;  %9461 = vmatmul.mubr.msk.f32.vlgmr.msra.gmra.mrb[2].mxu1 %vm222_vm0, %v9267_v52 }
 0x1d6   : > { %v7413_v12 = vsel %vm7411_vm8, %v7398_v10, %v7400_v11  ;;  %7564 = vmatprep.mubr.f32.mxu1 %v9790_v0  ;;  %7493 = vmatprep.mubr.f32.mxu0 %v9790_v0 }
 0x1d7   : > { %7429 = vmatprep.subr.mxu0 %v7413_v12 }
 0x1d9   : > { %v7396_v13 = vpop.permute.xlu0 %7395  ;;  %v7402_v14 = vpop.permute.xlu1 %7401 }
 0x1da   : > { %v7412_v16 = vsel %vm7411_vm8, %v7396_v13, %v7398_v10  ;;  %v7414_v22 = vsel %vm7411_vm8, %v7400_v11, %v7402_v14 }
 0x1db   : > { %7430 = vmatpush1.msra.mxu0 %v7412_v16  ;;  %v9292_v16 = vld [vmem:[%s10841_s1 + $0xd0] sm:$0xff] }
 0x1dc   : > { %9273 = vmatmul.mubr.msk.f32.vlgmr.msra.gmra.mrb[0].mxu0 %vm222_vm0, %v9272_v15 }
 0x1dd   : > { %v7404_v17 = vpop.permute.xlu0 %7403  ;;  %v7406_v20 = vpop.permute.xlu1 %7405  ;;  %7635 = vmatprep.mubr.f32.mxu0 %v9790_v0 }
 0x1de   : > { %v7415_v21 = vsel %vm7411_vm8, %v7402_v14, %v7404_v17  ;;  %v7416_v19 = vsel %vm7411_vm8, %v7404_v17, %v7406_v20 }
 0x1df   : > { %7500 = vmatprep.subr.mxu1 %v7415_v21 }
 0x1e0   : > { %7501 = vmatpush1.msra.mxu1 %v7414_v22 }
 0x1e1   : > { %v7408_v23 = vpop.permute.xlu0 %7407  ;;  %v7410_v24 = vpop.permute.xlu1 %7409  ;;  %9463 = vmatprep.subr.mxu1 %v9790_v0  ;;  %9274 = vmatmul.mubr.msk.f32.vlgmr.msra.gmra.mrb[0].mxu1 %vm222_vm0, %v9272_v15 }
 0x1e2   : > { %v7418_v25 = vsel %vm7411_vm8, %v7408_v23, %v7410_v24  ;;  %v7417_v18 = vsel %vm7411_vm8, %v7406_v20, %v7408_v23  ;;  %9465 = vmatprep.mubr.msk.f32.mxu1 %vm9792_vm1, %v9790_v0 }
 0x1e3   : > { %7571 = vmatprep.subr.mxu0 %v7417_v18  ;;  %9464 = vmatpush3.msra.mxu1 %v7418_v25 }
 0x1e4   : > { %7572 = vmatpush1.msra.mxu0 %v7416_v19 }
 0x1e5   : > { %v7724_v26 = vpop.permute.xlu0 %7723  ;;  %v7726_v27 = vpop.permute.xlu1 %7725  ;;  %9275 = vmatmul.mubr.msk.f32.vlgmr.msra.gmra.mrb[2].mxu0 %vm222_vm0, %v9272_v15  ;;  %9466 = vmatmul.mubr.msk.f32.vlgmr.msra.gmra.mrb[2].mxu1 %vm222_vm0, %v9272_v15 }
 0x1e6   : > { %v7739_v28 = vsel %vm7737_vm9, %v7724_v26, %v7726_v27  ;;  %7890 = vmatprep.mubr.f32.mxu1 %v9790_v0  ;;  %7819 = vmatprep.mubr.f32.mxu0 %v9790_v0 }
 0x1e7   : > { %7755 = vmatprep.subr.mxu0 %v7739_v28 }
 0x1e9   : > { %v7722_v29 = vpop.permute.xlu0 %7721  ;;  %v7728_v9 = vpop.permute.xlu1 %7727 }
 0x1ea   : > { %v7738_v30 = vsel %vm7737_vm9, %v7722_v29, %v7724_v26  ;;  %v7740_v32 = vsel %vm7737_vm9, %v7726_v27, %v7728_v9 }
 0x1eb   : > { %7756 = vmatpush1.msra.mxu0 %v7738_v30 }
 0x1ec   : > { %9278 = vmatmul.mubr.msk.f32.vlgmr.msra.gmra.mrb[0].mxu0 %vm222_vm0, %v9277_v55 }
 0x1ed   : > { %v7730_v3 = vpop.permute.xlu0 %7729  ;;  %v7732_v58 = vpop.permute.xlu1 %7731  ;;  %7961 = vmatprep.mubr.f32.mxu0 %v9790_v0 }
 0x1ee   : > { %v7741_v31 = vsel %vm7737_vm9, %v7728_v9, %v7730_v3  ;;  %v7742_v35 = vsel %vm7737_vm9, %v7730_v3, %v7732_v58 }
 0x1ef   : > { %7826 = vmatprep.subr.mxu1 %v7741_v31 }
 0x1f0   : > { %7827 = vmatpush1.msra.mxu1 %v7740_v32 }
 0x1f1   : > { %v7734_v33 = vpop.permute.xlu0 %7733  ;;  %v7736_v63 = vpop.permute.xlu1 %7735  ;;  %9468 = vmatprep.subr.mxu1 %v9790_v0  ;;  %9279 = vmatmul.mubr.msk.f32.vlgmr.msra.gmra.mrb[0].mxu1 %vm222_vm0, %v9277_v55 }
 0x1f2   : > { %v7744_v4 = vsel %vm7737_vm9, %v7734_v33, %v7736_v63  ;;  %v7743_v34 = vsel %vm7737_vm9, %v7732_v58, %v7734_v33  ;;  %9470 = vmatprep.mubr.msk.f32.mxu1 %vm9792_vm1, %v9790_v0 }
 0x1f3   : > { %7897 = vmatprep.subr.mxu0 %v7743_v34  ;;  %9469 = vmatpush3.msra.mxu1 %v7744_v4 }
 0x1f4   : > { %7898 = vmatpush1.msra.mxu0 %v7742_v35 }
 0x1f5   : > { %v8050_v36 = vpop.permute.xlu0 %8049  ;;  %v8052_v37 = vpop.permute.xlu1 %8051  ;;  %9280 = vmatmul.mubr.msk.f32.vlgmr.msra.gmra.mrb[2].mxu0 %vm222_vm0, %v9277_v55  ;;  %9471 = vmatmul.mubr.msk.f32.vlgmr.msra.gmra.mrb[2].mxu1 %vm222_vm0, %v9277_v55 }
 0x1f6   : > { %v8065_v38 = vsel %vm8063_vm10, %v8050_v36, %v8052_v37  ;;  %8216 = vmatprep.mubr.f32.mxu1 %v9790_v0  ;;  %8145 = vmatprep.mubr.f32.mxu0 %v9790_v0 }
 0x1f7   : > { %8081 = vmatprep.subr.mxu0 %v8065_v38 }
 0x1f9   : > { %v8048_v39 = vpop.permute.xlu0 %8047  ;;  %v8054_v40 = vpop.permute.xlu1 %8053 }
 0x1fa   : > { %v8064_v42 = vsel %vm8063_vm10, %v8048_v39, %v8050_v36  ;;  %v8066_v46 = vsel %vm8063_vm10, %v8052_v37, %v8054_v40 }
 0x1fb   : > { %8082 = vmatpush1.msra.mxu0 %v8064_v42 }
 0x1fc   : > { %9283 = vmatmul.mubr.msk.f32.vlgmr.msra.gmra.mrb[0].mxu0 %vm222_vm0, %v9282_v41 }
 0x1fd   : > { %v8056_v43 = vpop.permute.xlu0 %8055  ;;  %v8058_v44 = vpop.permute.xlu1 %8057  ;;  %8287 = vmatprep.mubr.f32.mxu0 %v9790_v0 }
 0x1fe   : > { %v8067_v45 = vsel %vm8063_vm10, %v8054_v40, %v8056_v43  ;;  %v8068_v2 = vsel %vm8063_vm10, %v8056_v43, %v8058_v44 }
 0x1ff   : > { %8152 = vmatprep.subr.mxu1 %v8067_v45 }
 0x200   : > { %8153 = vmatpush1.msra.mxu1 %v8066_v46 }
 0x201   : > { %v8060_v1 = vpop.permute.xlu0 %8059  ;;  %v8062_v47 = vpop.permute.xlu1 %8061  ;;  %9473 = vmatprep.subr.mxu1 %v9790_v0  ;;  %9284 = vmatmul.mubr.msk.f32.vlgmr.msra.gmra.mrb[0].mxu1 %vm222_vm0, %v9282_v41 }
 0x202   : > { %v8070_v48 = vsel %vm8063_vm10, %v8060_v1, %v8062_v47  ;;  %v8069_v49 = vsel %vm8063_vm10, %v8058_v44, %v8060_v1  ;;  %9475 = vmatprep.mubr.msk.f32.mxu1 %vm9792_vm1, %v9790_v0 }
 0x203   : > { %8223 = vmatprep.subr.mxu0 %v8069_v49  ;;  %9474 = vmatpush3.msra.mxu1 %v8070_v48 }
 0x204   : > { %8224 = vmatpush1.msra.mxu0 %v8068_v2 }
 0x205   : > { %v8376_v50 = vpop.permute.xlu0 %8375  ;;  %v8378_v51 = vpop.permute.xlu1 %8377  ;;  %9285 = vmatmul.mubr.msk.f32.vlgmr.msra.gmra.mrb[2].mxu0 %vm222_vm0, %v9282_v41  ;;  %9476 = vmatmul.mubr.msk.f32.vlgmr.msra.gmra.mrb[2].mxu1 %vm222_vm0, %v9282_v41 }
 0x206   : > { %v8391_v7 = vsel %vm8389_vm11, %v8376_v50, %v8378_v51  ;;  %8542 = vmatprep.mubr.f32.mxu1 %v9790_v0  ;;  %8471 = vmatprep.mubr.f32.mxu0 %v9790_v0 }
 0x207   : > { %8407 = vmatprep.subr.mxu0 %v8391_v7 }
 0x209   : > { %v8374_v6 = vpop.permute.xlu0 %8373  ;;  %v8380_v52 = vpop.permute.xlu1 %8379 }
 0x20a   : > { %v8390_v54 = vsel %vm8389_vm11, %v8374_v6, %v8376_v50  ;;  %v8392_v5 = vsel %vm8389_vm11, %v8378_v51, %v8380_v52 }
 0x20b   : > { %8408 = vmatpush1.msra.mxu0 %v8390_v54 }
 0x20c   : > { %9288 = vmatmul.mubr.msk.f32.vlgmr.msra.gmra.mrb[0].mxu0 %vm222_vm0, %v9287_v53 }
 0x20d   : > { %v8382_v8 = vpop.permute.xlu0 %8381  ;;  %v8384_v56 = vpop.permute.xlu1 %8383  ;;  %8613 = vmatprep.mubr.f32.mxu0 %v9790_v0 }
 0x20e   : > { %v8393_v57 = vsel %vm8389_vm11, %v8380_v52, %v8382_v8  ;;  %v8394_v10 = vsel %vm8389_vm11, %v8382_v8, %v8384_v56 }
 0x20f   : > { %8478 = vmatprep.subr.mxu1 %v8393_v57 }
 0x210   : > { %8479 = vmatpush1.msra.mxu1 %v8392_v5 }
 0x211   : > { %v8386_v59 = vpop.permute.xlu0 %8385  ;;  %v8388_v60 = vpop.permute.xlu1 %8387  ;;  %9478 = vmatprep.subr.mxu1 %v9790_v0  ;;  %9289 = vmatmul.mubr.msk.f32.vlgmr.msra.gmra.mrb[0].mxu1 %vm222_vm0, %v9287_v53 }
 0x212   : > { %v8396_v61 = vsel %vm8389_vm11, %v8386_v59, %v8388_v60  ;;  %v8395_v62 = vsel %vm8389_vm11, %v8384_v56, %v8386_v59  ;;  %9480 = vmatprep.mubr.msk.f32.mxu1 %vm9792_vm1, %v9790_v0 }
 0x213   : > { %8549 = vmatprep.subr.mxu0 %v8395_v62  ;;  %9479 = vmatpush3.msra.mxu1 %v8396_v61 }
 0x214   : > { %8550 = vmatpush1.msra.mxu0 %v8394_v10 }
 0x215   : > { %v8702_v11 = vpop.permute.xlu0 %8701  ;;  %v8704_v12 = vpop.permute.xlu1 %8703  ;;  %9290 = vmatmul.mubr.msk.f32.vlgmr.msra.gmra.mrb[2].mxu0 %vm222_vm0, %v9287_v53  ;;  %9481 = vmatmul.mubr.msk.f32.vlgmr.msra.gmra.mrb[2].mxu1 %vm222_vm0, %v9287_v53 }
 0x216   : > { %v8717_v13 = vsel %vm8715_vm12, %v8702_v11, %v8704_v12  ;;  %8797 = vmatprep.mubr.f32.mxu0 %v9790_v0  ;;  %8868 = vmatprep.mubr.f32.mxu1 %v9790_v0 }
 0x217   : > { %8733 = vmatprep.subr.mxu0 %v8717_v13 }
 0x219   : > { %v8700_v14 = vpop.permute.xlu0 %8699  ;;  %v8706_v15 = vpop.permute.xlu1 %8705 }
 0x21a   : > { %v8716_v17 = vsel %vm8715_vm12, %v8700_v14, %v8702_v11  ;;  %v8718_v23 = vsel %vm8715_vm12, %v8704_v12, %v8706_v15 }
 0x21b   : > { %8734 = vmatpush1.msra.mxu0 %v8716_v17 }
 0x21c   : > { %9293 = vmatmul.mubr.msk.f32.vlgmr.msra.gmra.mrb[0].mxu0 %vm222_vm0, %v9292_v16 }
 0x21d   : > { %v8708_v20 = vpop.permute.xlu0 %8707  ;;  %v8710_v21 = vpop.permute.xlu1 %8709  ;;  %8939 = vmatprep.mubr.f32.mxu0 %v9790_v0 }
 0x21e   : > { %v8719_v22 = vsel %vm8715_vm12, %v8706_v15, %v8708_v20  ;;  %v8720_v26 = vsel %vm8715_vm12, %v8708_v20, %v8710_v21 }
 0x21f   : > { %8804 = vmatprep.subr.mxu1 %v8719_v22 }
 0x220   : > { %8805 = vmatpush1.msra.mxu1 %v8718_v23 }
 0x221   : > { %v8712_v24 = vpop.permute.xlu0 %8711  ;;  %v8714_v25 = vpop.permute.xlu1 %8713  ;;  %9294 = vmatmul.mubr.msk.f32.vlgmr.msra.gmra.mrb[0].mxu1 %vm222_vm0, %v9292_v16  ;;  %9483 = vmatprep.subr.mxu1 %v9790_v0 }
 0x222   : > { %v8722_v18 = vsel %vm8715_vm12, %v8712_v24, %v8714_v25  ;;  %v8721_v19 = vsel %vm8715_vm12, %v8710_v21, %v8712_v24  ;;  %9485 = vmatprep.mubr.msk.f32.mxu1 %vm9792_vm1, %v9790_v0 }
 0x223   : > { %8875 = vmatprep.subr.mxu0 %v8721_v19  ;;  %9484 = vmatpush3.msra.mxu1 %v8722_v18 }
 0x224   : > { %8876 = vmatpush1.msra.mxu0 %v8720_v26 }
 0x225   : > { %9295 = vmatmul.mubr.msk.f32.vlgmr.msra.gmra.mrb[2].mxu0 %vm222_vm0, %v9292_v16  ;;  %9486 = vmatmul.mubr.msk.f32.vlgmr.msra.gmra.mrb[2].mxu1 %vm222_vm0, %v9292_v16 }
 0x234   : > { %v9032_v27 = vpop.permute.xlu1 %9031 }
 0x237   : > { %v212_v28 = vpop.permute.xlu0 %211 }
 0x239   : > { %v9043_v9 = vpop.permute.xlu1 %9042 }
 0x2ef   : > { %v8799_v29 = vpop.f32.mrb[0].mxu0 }
 0x2f0   : > { %v9488_v55 = vadd.f32 %v8799_v29, %v212_v28  ;;  %v8801_v30 = vpop.f32.mrb[1].mxu0 }
 0x2f1   : > { %v9489_v3 = vadd.f32 %v8801_v30, %v212_v28 }
 0x2f2   : > { %vm9023_vm13 = vcmp.ge.f32.partialorder %v9488_v55, 0.0  ;;  %v9034_v58 = vmul.f32 %v9488_v55, %v9032_v27  ;;  %v9045_v0 = vmul.f32 %v9488_v55, %v9043_v9 }
 0x2f3   : > { %vm9024_vm1 = vcmp.ge.f32.partialorder %v9489_v3, 0.0  ;;  %v9035_v31 = vmul.f32 %v9489_v3, %v9032_v27  ;;  %v9046_v32 = vmul.f32 %v9489_v3, %v9043_v9 }
 0x2f4   : > { %v9052_v33 = vsel %vm9023_vm13, %v9034_v58, %v9045_v0  ;;  %v8870_v63 = vpop.f32.mrb[0].mxu1 }
 0x2f5   : > { %v9053_v4 = vsel %vm9024_vm1, %v9035_v31, %v9046_v32  ;;  %9059 = vst [vmem:[%s10822_s10] sm:$0xff] %v9052_v33  ;;  %v9490_v34 = vadd.f32 %v8870_v63, %v212_v28  ;;  %v8872_v35 = vpop.f32.mrb[1].mxu1 }
 0x2f6   : > { %9060 = vst [vmem:[%s10822_s10 + $0x8] sm:$0xff] %v9053_v4  ;;  %v9491_v36 = vadd.f32 %v8872_v35, %v212_v28 }
 0x2f7   : > { %vm9025_vm0 = vcmp.ge.f32.partialorder %v9490_v34, 0.0  ;;  %v9036_v37 = vmul.f32 %v9490_v34, %v9032_v27  ;;  %v9047_v38 = vmul.f32 %v9490_v34, %v9043_v9 }
 0x2f8   : > { %vm9026_vm14 = vcmp.ge.f32.partialorder %v9491_v36, 0.0  ;;  %v9037_v39 = vmul.f32 %v9491_v36, %v9032_v27  ;;  %v9048_v40 = vmul.f32 %v9491_v36, %v9043_v9  ;;  %v8941_v41 = vpop.f32.mrb[2].mxu0  ;;  %v9012_v42 = vpop.f32.mrb[2].mxu1 }
 0x2f9   : > { %v9054_v43 = vsel %vm9025_vm0, %v9036_v37, %v9047_v38  ;;  %v9492_v44 = vadd.f32 %v8941_v41, %v212_v28  ;;  %v9494_v45 = vadd.f32 %v9012_v42, %v212_v28  ;;  %v8943_v46 = vpop.f32.mrb[3].mxu0  ;;  %v9487_v1 = vpop.f32.mrb[3].mxu1 }
 0x2fa   : > { %9061 = vst [vmem:[%s10822_s10 + $0x10] sm:$0xff] %v9054_v43  ;;  %v9055_v47 = vsel %vm9026_vm14, %v9037_v39, %v9048_v40  ;;  %v9493_v48 = vadd.f32 %v8943_v46, %v212_v28 }
 0x2fb   : > { %9062 = vst [vmem:[%s10822_s10 + $0x18] sm:$0xff] %v9055_v47  ;;  %vm9027_vm15 = vcmp.ge.f32.partialorder %v9492_v44, 0.0  ;;  %v9038_v49 = vmul.f32 %v9492_v44, %v9032_v27  ;;  %v9049_v2 = vmul.f32 %v9492_v44, %v9043_v9  ;;  %vm9029_vm2 = vcmp.ge.f32.partialorder %v9494_v45, 0.0 }
 0x2fc   : > { %v9040_v50 = vmul.f32 %v9494_v45, %v9032_v27  ;;  %v9051_v51 = vmul.f32 %v9494_v45, %v9043_v9  ;;  %vm9028_vm3 = vcmp.ge.f32.partialorder %v9493_v48, 0.0  ;;  %v9039_v7 = vmul.f32 %v9493_v48, %v9032_v27 }
 0x2fd   : > { %v9056_v6 = vsel %vm9027_vm15, %v9038_v49, %v9049_v2  ;;  %v9050_v52 = vmul.f32 %v9493_v48, %v9043_v9 }
 0x2fe   : > { %9063 = vst [vmem:[%s10822_s10 + $0x20] sm:$0xff] %v9056_v6  ;;  %v9058_v53 = vsel %vm9029_vm2, %v9040_v50, %v9051_v51 }
 0x2ff   : > { %9065 = vst [vmem:[%s10822_s10 + $0x30] sm:$0xff] %v9058_v53  ;;  %v9057_v54 = vsel %vm9028_vm3, %v9039_v7, %v9050_v52 }
 0x300   : > { %9064 = vst [vmem:[%s10822_s10 + $0x28] sm:$0xff] %v9057_v54 }
 0x301 PF: > { %s13_s14 = sadd.s32 1, %s9788_s14   ;;  %s10844_s12 = smov %s9784_s13 }
 0x302   : > { %p10_p5 = scmp.ge.s32.totalorder %s13_s14, 4   ;;  %s10845_s13 = smov %s10847_s15 }
 0x304   :  { %12 = sbr.rel (!%p10_p5) target bundleno = 2 (0x2), region = 88 }

</bundles_post_ra>
